<compile_context>
chip_gen: v7x
topology: tpu7x:2x2x1
jax: 0.10.0
libtpu: 0.0.40
codegen_flags: <defaults>
</compile_context>

<pallas_src>
import functools

import jax
import jax.numpy as jnp
import numpy as np
from jax.experimental import pallas as pl
from jax.experimental.pallas import tpu as pltpu

# ------------------------- config (mirrors Lift3DEncoder.__init__) -------------------------
IMAGE_RESIZE_SHAPE = (16, 16)          # inputs are built directly at this size
PATCH = 4                              # stand-in encoder patch size -> H_ = H / PATCH
HIDDEN = 32                            # real encoder feature channels C
C_PAD = 128                            # lane-dense channel padding; column HIDDEN = count
CUBE_BBOX_SIZE = 8                     # int -> low_bound = [-4]*3, high_bound = [4]*3
LOW_BOUND = [-(CUBE_BBOX_SIZE // 2)] * 3
HIGH_BOUND = [CUBE_BBOX_SIZE // 2] * 3
NX = HIGH_BOUND[0] - LOW_BOUND[0]
NY = HIGH_BOUND[1] - LOW_BOUND[1]
NZ = HIGH_BOUND[2] - LOW_BOUND[2]
N_VOX = NX * NY * NZ                   # per-batch voxel count
P_TILE_MAX = 512                       # max points per grid step (MXU contraction depth)


def _round_up(x, m):
    return ((x + m - 1) // m) * m


# ---------------- fused Pallas kernel: patch-embed + voxelize + scatter_mean ----------------
def _lift3d_kernel(npts_ref, vs_ref, patches_ref, pts_ref, msk_ref, w_ref, bias_ref, out_ref,
                   *, nx, ny, nz, low, p_tile, n_vox, c_col):
    b = pl.program_id(0)
    t = pl.program_id(1)

    # Output block for batch b is resident across the reduction (t) axis -> accumulate in it.
    @pl.when(t == 0)
    def _():
        out_ref[...] = jnp.zeros_like(out_ref)

    patches = patches_ref[0]          # [P, K]   float32
    pts = pts_ref[0]                  # [P, 3]   float32
    fmask = msk_ref[0]                # [P, 1]   float32

    # Fused stand-in encoder (patch embedding), lane-padded to C_PAD.
    # Column c_col of w_aug is 0 and of bias is 1.0 -> feats_aug[:, c_col] == 1.0 (the count).
    feats_aug = (jnp.dot(patches, w_ref[...], preferred_element_type=jnp.float32)
                 + bias_ref[...])                                               # [P, C_PAD]

    # Ragged-tail mask: no host-side padding of the point axis; also zeroes any junk values
    # read from a partial trailing block so 0 * junk can never produce NaN in the matmul.
    pid = t * p_tile + jax.lax.broadcasted_iota(jnp.int32, (p_tile, 1), 0)      # [P, 1]
    in_range = pid < npts_ref[0]
    feats_aug = jnp.where(in_range, feats_aug, 0.0)

    # get_points3d_ijk_from_lower_bound semantics: round((p - vs/2)/vs) - low_bound
    vsx = vs_ref[b, 0]
    vsy = vs_ref[b, 1]
    vsz = vs_ref[b, 2]
    ii = jnp.round((pts[:, 0:1] - vsx * 0.5) / vsx).astype(jnp.int32) - low[0]
    jj = jnp.round((pts[:, 1:2] - vsy * 0.5) / vsy).astype(jnp.int32) - low[1]
    kk = jnp.round((pts[:, 2:3] - vsz * 0.5) / vsz).astype(jnp.int32) - low[2]

    valid = ((ii >= 0) & (ii < nx) & (jj >= 0) & (jj < ny) & (kk >= 0) & (kk < nz)
             & (fmask > 0.0) & in_range)                                        # [P, 1]

    # Batch-local rank: each batch owns its own contiguous [X*Y*Z, C_PAD] output block, so
    # the flat result is batch-major [B, X, Y, Z, C] with no post-kernel transpose. This
    # groups points per (i, j, k, b) exactly like get_rank + scatter_mean.
    lrank = ii * (ny * nz) + jj * nz + kk
    lrank = jnp.where(valid, lrank, -1)                                         # [P, 1]

    vox_ids = jax.lax.broadcasted_iota(jnp.int32, (p_tile, n_vox), 1)           # [P, V]
    onehot = (lrank == vox_ids).astype(jnp.float32)                             # [P, V]

    # Single MXU pass: out[v, :C] += feature sums, out[v, C] += counts.
    out_ref[...] += jax.lax.dot_general(
        onehot, feats_aug, (((0,), (0,)), ((), ())), preferred_element_type=jnp.float32)

    # Finalize this batch: scatter_mean (count clamped to 1, empty voxels stay 0).
    @pl.when(t == pl.num_programs(1) - 1)
    def _():
        acc = out_ref[...]
        cnt = acc[:, c_col:c_col + 1]
        out_ref[...] = acc / jnp.maximum(cnt, 1.0)


def lift3d_voxelize(patches, points_3d, fmask, neck_voxel_sizes, w_aug, b_aug):
    """patches [B, Np, K], points_3d [B, Np, 3], fmask [B, Np, 1] -> cube [B*N_VOX, C_PAD]."""
    B, n_pts, K = patches.shape
    p_tile = min(P_TILE_MAX, _round_up(n_pts, 8))
    n_tiles = pl.cdiv(n_pts, p_tile)
    npts_arr = jnp.full((1,), n_pts, jnp.int32)

    kernel = functools.partial(
        _lift3d_kernel, nx=NX, ny=NY, nz=NZ, low=tuple(LOW_BOUND),
        p_tile=p_tile, n_vox=N_VOX, c_col=HIDDEN)

    return pl.pallas_call(
        kernel,
        out_shape=jax.ShapeDtypeStruct((B * N_VOX, C_PAD), jnp.float32),
        grid=(B, n_tiles),
        in_specs=[
            pl.BlockSpec(memory_space=pltpu.MemorySpace.SMEM),          # n_pts [1] int32
            pl.BlockSpec(memory_space=pltpu.MemorySpace.SMEM),          # neck_voxel_sizes [B,3]
            pl.BlockSpec((1, p_tile, K), lambda b, t: (b, t, 0)),       # patches
            pl.BlockSpec((1, p_tile, 3), lambda b, t: (b, t, 0)),       # points
            pl.BlockSpec((1, p_tile, 1), lambda b, t: (b, t, 0)),       # unproject mask
            pl.BlockSpec((K, C_PAD), lambda b, t: (0, 0)),              # augmented weight
            pl.BlockSpec((1, C_PAD), lambda b, t: (0, 0)),              # augmented bias
        ],
        out_specs=pl.BlockSpec((N_VOX, C_PAD), lambda b, t: (b, 0)),
        compiler_params=pltpu.CompilerParams(
            dimension_semantics=("parallel", "arbitrary")),
    )(npts_arr, neck_voxel_sizes.astype(jnp.float32), patches, points_3d, fmask, w_aug, b_aug)


# ------------------------------------ forward (glue) ------------------------------------
def _patchify(images):
    B, N, H, W, _ = images.shape
    p = PATCH
    H_, W_ = H // p, W // p
    x = images.reshape(B, N, H_, p, W_, p, 3)
    x = x.transpose(0, 1, 2, 4, 3, 5, 6)                   # [B, N, H_, W_, p, p, 3]
    return x.reshape(B, N * H_ * W_, p * p * 3), (H_, W_)


def lift3d_forward(params, images, unproject_mask, depth, camera_pose, camera_intrinsic,
                   neck_voxel_sizes):
    """Lift3DEncoder.forward (point-map depth branch, normalize_cube_feature=True).

    Returns the dense cube [B, X, Y, Z, C] (fvdb VDBTensor construction skipped).
    """
    del camera_pose, camera_intrinsic   # unused in point-map mode
    B, N, H, W, _ = images.shape
    K = 3 * PATCH * PATCH

    patches, (H_, W_) = _patchify(images)                               # [B, Np, K]
    n_pts = N * H_ * W_

    # feature_unproject_mask: nearest downsample of the mask to feature resolution
    fmask = unproject_mask[:, :, ::PATCH, ::PATCH, 0]
    fmask = fmask.reshape(B, n_pts, 1).astype(jnp.float32)

    # point-map branch: depth is [B, N, H_, W_, 3] -> points_3d [B, Np, 3]
    points_3d = depth.reshape(B, n_pts, 3).astype(jnp.float32)

    # augmented encoder params: columns [0:C) = embedding, column C = count (via bias 1.0),
    # remaining lane padding is zero.
    w_aug = jnp.zeros((K, C_PAD), jnp.float32).at[:, :HIDDEN].set(params["w"])
    b_aug = (jnp.zeros((1, C_PAD), jnp.float32)
             .at[0, :HIDDEN].set(params["b"])
             .at[0, HIDDEN].set(1.0))

    cube = lift3d_voxelize(patches, points_3d, fmask, neck_voxel_sizes, w_aug, b_aug)
    # already batch-major -> just reshape and drop the lane padding / count column
    return cube.reshape(B, NX, NY, NZ, C_PAD)[..., :HIDDEN]


# ------------------------------ pure-JAX reference (for checking) ------------------------------
def reference_forward(params, images, unproject_mask, depth, neck_voxel_sizes):
    B, N, H, W, _ = images.shape
    C = HIDDEN
    patches, (H_, W_) = _patchify(images)
    feats = (patches.reshape(-1, patches.shape[-1]) @ params["w"] + params["b"])
    feats = feats.reshape(B, N * H_ * W_, C)
    fmask = unproject_mask[:, :, ::PATCH, ::PATCH, 0].reshape(B, N * H_ * W_)
    pts = depth.reshape(B, N * H_ * W_, 3)

    vs = neck_voxel_sizes[:, None, :]
    low = jnp.array(LOW_BOUND)
    bl = jnp.array(HIGH_BOUND) - low
    ijk = jnp.round((pts - vs / 2.0) / vs).astype(jnp.int32) - low
    valid = ((ijk[..., 0] >= 0) & (ijk[..., 0] < bl[0])
             & (ijk[..., 1] >= 0) & (ijk[..., 1] < bl[1])
             & (ijk[..., 2] >= 0) & (ijk[..., 2] < bl[2])
             & (fmask > 0))
    batch_ix = jnp.arange(B)[:, None]
    rank = ijk[..., 0] * (NY * NZ * B) + ijk[..., 1] * (NZ * B) + ijk[..., 2] * B + batch_ix
    V = NX * NY * NZ * B
    rank = jnp.where(valid, rank, V)
    sums = jax.ops.segment_sum(feats.reshape(-1, C), rank.reshape(-1), num_segments=V + 1)[:V]
    cnts = jax.ops.segment_sum(valid.reshape(-1).astype(jnp.float32), rank.reshape(-1),
                               num_segments=V + 1)[:V]
    mean = sums / jnp.maximum(cnts, 1.0)[:, None]
    return mean.reshape(NX, NY, NZ, B, C).transpose(3, 0, 1, 2, 4)


# -------------------------------------------- main --------------------------------------------
if __name__ == "__main__":
    key = jax.random.PRNGKey(0)
    B, N = 2, 2
    H, W = IMAGE_RESIZE_SHAPE
    H_, W_ = H // PATCH, W // PATCH
    C = HIDDEN

    k1, k2, k3, k4, k5 = jax.random.split(key, 5)
    images = jax.random.uniform(k1, (B, N, H, W, 3), jnp.float32)
    unproject_mask = (jax.random.uniform(k2, (B, N, H, W, 1)) > 0.3).astype(jnp.float32)
    # point-map depth (last dim = 3): 3D points in grid coordinates at feature resolution
    depth = jax.random.uniform(k3, (B, N, H_, W_, 3), jnp.float32, minval=-4.5, maxval=4.5)
    camera_pose = jnp.tile(jnp.eye(4, dtype=jnp.float32), (B, N, 1, 1))
    camera_intrinsic = jnp.ones((B, N, 6), jnp.float32)
    neck_voxel_sizes = jnp.ones((B, 3), jnp.float32)

    # deterministic stand-in encoder params (patch embedding)
    params = {
        "w": jax.random.normal(k4, (3 * PATCH * PATCH, C), jnp.float32) * 0.05,
        "b": jax.random.normal(k5, (C,), jnp.float32) * 0.01,
    }

    final = jax.jit(lift3d_forward)(params, images, unproject_mask, depth,
                                    camera_pose, camera_intrinsic, neck_voxel_sizes)
    final = jax.block_until_ready(final)

    assert final.shape == (B, NX, NY, NZ, C)
    ref = reference_forward(params, images, unproject_mask, depth, neck_voxel_sizes)
    np.testing.assert_allclose(np.asarray(final), np.asarray(ref), atol=1e-4, rtol=1e-4)
    print("KERNEL_OK")
</pallas_src>

<mosaic_0001>
module attributes {stable_mosaic.version = 11 : i64} {
  func.func @_lift3d_kernel(%arg0: i32, %arg1: i32, %arg2: memref<1xi32, #tpu.memory_space<smem>>, %arg3: memref<2x3xf32, #tpu.memory_space<smem>>, %arg4: memref<1x32x48xf32, #tpu.memory_space<vmem>>, %arg5: memref<1x32x3xf32, #tpu.memory_space<vmem>>, %arg6: memref<1x32x1xf32, #tpu.memory_space<vmem>>, %arg7: memref<48x128xf32, #tpu.memory_space<vmem>>, %arg8: memref<1x128xf32, #tpu.memory_space<vmem>>, %arg9: memref<512x128xf32, #tpu.memory_space<vmem>>) attributes {dimension_semantics = [#tpu.dimension_semantics<parallel>, #tpu.dimension_semantics<arbitrary>], iteration_bounds = array<i64: 2, 1>, scalar_prefetch = 0 : i64, scratch_operands = 0 : i64, tpu.core_type = #tpu.core_type<tc>, window_params = [{transform_indices = @transform_0, window_bounds = array<i64: 1>}, {transform_indices = @transform_1, window_bounds = array<i64: 2, 3>}, {transform_indices = @transform_2, window_bounds = array<i64: 1, 32, 48>}, {transform_indices = @transform_3, window_bounds = array<i64: 1, 32, 3>}, {transform_indices = @transform_4, window_bounds = array<i64: 1, 32, 1>}, {pipeline_mode = #tpu.pipeline_mode<synchronous>, transform_indices = @transform_5, window_bounds = array<i64: 48, 128>}, {pipeline_mode = #tpu.pipeline_mode<synchronous>, transform_indices = @transform_6, window_bounds = array<i64: 1, 128>}, {transform_indices = @transform_7, window_bounds = array<i64: 512, 128>}]} {
    %c0_i32 = arith.constant 0 : i32
    %0 = arith.cmpi eq, %arg1, %c0_i32 : i32
    %1 = arith.extui %0 : i1 to i32
    %c0_i32_0 = arith.constant 0 : i32
    %2 = arith.cmpi ne, %1, %c0_i32_0 : i32
    scf.if %2 {
      %cst_35 = arith.constant 0.000000e+00 : f32
      %102 = vector.broadcast %cst_35 : f32 to vector<512x128xf32>
      %c0_36 = arith.constant 0 : index
      %c0_37 = arith.constant 0 : index
      %103 = vector.load %arg9[%c0_36, %c0_37] : memref<512x128xf32, #tpu.memory_space<vmem>>, vector<512x128xf32>
      tpu.vector_store %arg9[%c0_36, %c0_37], %102 {strides = array<i32>} : memref<512x128xf32, #tpu.memory_space<vmem>>, vector<512x128xf32>,
    } else {
    }
    %c0 = arith.constant 0 : index
    %c0_1 = arith.constant 0 : index
    %c0_2 = arith.constant 0 : index
    %3 = vector.load %arg4[%c0, %c0_1, %c0_2] : memref<1x32x48xf32, #tpu.memory_space<vmem>>, vector<1x32x48xf32>
    %4 = vector.shape_cast %3 : vector<1x32x48xf32> to vector<32x48xf32>
    %c0_3 = arith.constant 0 : index
    %c0_4 = arith.constant 0 : index
    %c0_5 = arith.constant 0 : index
    %5 = vector.load %arg5[%c0_3, %c0_4, %c0_5] : memref<1x32x3xf32, #tpu.memory_space<vmem>>, vector<1x32x3xf32>
    %6 = vector.shape_cast %5 : vector<1x32x3xf32> to vector<32x3xf32>
    %c0_6 = arith.constant 0 : index
    %c0_7 = arith.constant 0 : index
    %c0_8 = arith.constant 0 : index
    %7 = vector.load %arg6[%c0_6, %c0_7, %c0_8] : memref<1x32x1xf32, #tpu.memory_space<vmem>>, vector<1x32x1xf32>
    %8 = vector.shape_cast %7 : vector<1x32x1xf32> to vector<32x1xf32>
    %c0_9 = arith.constant 0 : index
    %c0_10 = arith.constant 0 : index
    %9 = vector.load %arg7[%c0_9, %c0_10] : memref<48x128xf32, #tpu.memory_space<vmem>>, vector<48x128xf32>
    %cst = arith.constant dense<0.000000e+00> : vector<32x128xf32>
    %10 = tpu.matmul %4, %9, %cst {dimension_numbers = #tpu.dot_dimension_numbers<[1], [0], [0], [1], [0, 0, 1, 1], [], []>} : vector<32x48xf32>, vector<48x128xf32>, vector<32x128xf32> -> vector<32x128xf32>
    %c0_11 = arith.constant 0 : index
    %c0_12 = arith.constant 0 : index
    %11 = vector.load %arg8[%c0_11, %c0_12] : memref<1x128xf32, #tpu.memory_space<vmem>>, vector<1x128xf32>
    %12 = vector.broadcast %11 : vector<1x128xf32> to vector<32x128xf32>
    %13 = arith.addf %10, %12 : vector<32x128xf32>
    %c32_i32 = arith.constant 32 : i32
    %14 = arith.muli %arg1, %c32_i32 : i32
    %15 = tpu.iota {dimensions = array<i32: 0>} : vector<32x1xi32>
    %16 = vector.broadcast %14 : i32 to vector<32x1xi32>
    %17 = arith.addi %16, %15 : vector<32x1xi32>
    %c0_13 = arith.constant 0 : index
    %18 = memref.load %arg2[%c0_13] : memref<1xi32, #tpu.memory_space<smem>>
    %19 = vector.broadcast %18 : i32 to vector<32x1xi32>
    %20 = arith.cmpi slt, %17, %19 : vector<32x1xi32>
    %cst_14 = arith.constant 0.000000e+00 : f32
    %21 = vector.shape_cast %20 : vector<32x1xi1> to vector<32x1xi1>
    %22 = vector.broadcast %21 : vector<32x1xi1> to vector<32x128xi1>
    %23 = vector.broadcast %cst_14 : f32 to vector<32x128xf32>
    %24 = arith.select %22, %13, %23 : vector<32x128xi1>, vector<32x128xf32>
    %25 = arith.index_cast %arg0 : i32 to index
    %c0_15 = arith.constant 0 : index
    %26 = memref.load %arg3[%25, %c0_15] : memref<2x3xf32, #tpu.memory_space<smem>>
    %27 = arith.index_cast %arg0 : i32 to index
    %c1 = arith.constant 1 : index
    %28 = memref.load %arg3[%27, %c1] : memref<2x3xf32, #tpu.memory_space<smem>>
    %29 = arith.index_cast %arg0 : i32 to index
    %c2 = arith.constant 2 : index
    %30 = memref.load %arg3[%29, %c2] : memref<2x3xf32, #tpu.memory_space<smem>>
    %31 = vector.extract_strided_slice %6 {offsets = [0, 0], sizes = [32, 1], strides = [1, 1]} : vector<32x3xf32> to vector<32x1xf32>
    %cst_16 = arith.constant 5.000000e-01 : f32
    %32 = arith.mulf %26, %cst_16 : f32
    %33 = vector.broadcast %32 : f32 to vector<32x1xf32>
    %34 = arith.subf %31, %33 : vector<32x1xf32>
    %35 = vector.broadcast %26 : f32 to vector<32x1xf32>
    %36 = arith.divf %34, %35 : vector<32x1xf32>
    %37 = math.roundeven %36 : vector<32x1xf32>
    %38 = arith.fptosi %37 : vector<32x1xf32> to vector<32x1xi32>
    %c-4_i32 = arith.constant -4 : i32
    %39 = vector.broadcast %c-4_i32 : i32 to vector<32x1xi32>
    %40 = arith.subi %38, %39 : vector<32x1xi32>
    %41 = vector.extract_strided_slice %6 {offsets = [0, 1], sizes = [32, 1], strides = [1, 1]} : vector<32x3xf32> to vector<32x1xf32>
    %cst_17 = arith.constant 5.000000e-01 : f32
    %42 = arith.mulf %28, %cst_17 : f32
    %43 = vector.broadcast %42 : f32 to vector<32x1xf32>
    %44 = arith.subf %41, %43 : vector<32x1xf32>
    %45 = vector.broadcast %28 : f32 to vector<32x1xf32>
    %46 = arith.divf %44, %45 : vector<32x1xf32>
    %47 = math.roundeven %46 : vector<32x1xf32>
    %48 = arith.fptosi %47 : vector<32x1xf32> to vector<32x1xi32>
    %c-4_i32_18 = arith.constant -4 : i32
    %49 = vector.broadcast %c-4_i32_18 : i32 to vector<32x1xi32>
    %50 = arith.subi %48, %49 : vector<32x1xi32>
    %51 = vector.extract_strided_slice %6 {offsets = [0, 2], sizes = [32, 1], strides = [1, 1]} : vector<32x3xf32> to vector<32x1xf32>
    %cst_19 = arith.constant 5.000000e-01 : f32
    %52 = arith.mulf %30, %cst_19 : f32
    %53 = vector.broadcast %52 : f32 to vector<32x1xf32>
    %54 = arith.subf %51, %53 : vector<32x1xf32>
    %55 = vector.broadcast %30 : f32 to vector<32x1xf32>
    %56 = arith.divf %54, %55 : vector<32x1xf32>
    %57 = math.roundeven %56 : vector<32x1xf32>
    %58 = arith.fptosi %57 : vector<32x1xf32> to vector<32x1xi32>
    %c-4_i32_20 = arith.constant -4 : i32
    %59 = vector.broadcast %c-4_i32_20 : i32 to vector<32x1xi32>
    %60 = arith.subi %58, %59 : vector<32x1xi32>
    %c0_i32_21 = arith.constant 0 : i32
    %61 = vector.broadcast %c0_i32_21 : i32 to vector<32x1xi32>
    %62 = arith.cmpi sge, %40, %61 : vector<32x1xi32>
    %c8_i32 = arith.constant 8 : i32
    %63 = vector.broadcast %c8_i32 : i32 to vector<32x1xi32>
    %64 = arith.cmpi slt, %40, %63 : vector<32x1xi32>
    %65 = arith.andi %62, %64 : vector<32x1xi1>
    %c0_i32_22 = arith.constant 0 : i32
    %66 = vector.broadcast %c0_i32_22 : i32 to vector<32x1xi32>
    %67 = arith.cmpi sge, %50, %66 : vector<32x1xi32>
    %68 = arith.andi %65, %67 : vector<32x1xi1>
    %c8_i32_23 = arith.constant 8 : i32
    %69 = vector.broadcast %c8_i32_23 : i32 to vector<32x1xi32>
    %70 = arith.cmpi slt, %50, %69 : vector<32x1xi32>
    %71 = arith.andi %68, %70 : vector<32x1xi1>
    %c0_i32_24 = arith.constant 0 : i32
    %72 = vector.broadcast %c0_i32_24 : i32 to vector<32x1xi32>
    %73 = arith.cmpi sge, %60, %72 : vector<32x1xi32>
    %74 = arith.andi %71, %73 : vector<32x1xi1>
    %c8_i32_25 = arith.constant 8 : i32
    %75 = vector.broadcast %c8_i32_25 : i32 to vector<32x1xi32>
    %76 = arith.cmpi slt, %60, %75 : vector<32x1xi32>
    %77 = arith.andi %74, %76 : vector<32x1xi1>
    %cst_26 = arith.constant 0.000000e+00 : f32
    %78 = vector.broadcast %cst_26 : f32 to vector<32x1xf32>
    %79 = arith.cmpf ogt, %8, %78 : vector<32x1xf32>
    %80 = arith.andi %77, %79 : vector<32x1xi1>
    %81 = arith.andi %80, %20 : vector<32x1xi1>
    %c64_i32 = arith.constant 64 : i32
    %82 = vector.broadcast %c64_i32 : i32 to vector<32x1xi32>
    %83 = arith.muli %40, %82 : vector<32x1xi32>
    %c8_i32_27 = arith.constant 8 : i32
    %84 = vector.broadcast %c8_i32_27 : i32 to vector<32x1xi32>
    %85 = arith.muli %50, %84 : vector<32x1xi32>
    %86 = arith.addi %83, %85 : vector<32x1xi32>
    %87 = arith.addi %86, %60 : vector<32x1xi32>
    %c-1_i32 = arith.constant -1 : i32
    %88 = vector.broadcast %c-1_i32 : i32 to vector<32x1xi32>
    %89 = arith.select %81, %87, %88 : vector<32x1xi1>, vector<32x1xi32>
    %90 = tpu.iota {dimensions = array<i32: 1>} : vector<32x512xi32>
    %91 = vector.broadcast %89 : vector<32x1xi32> to vector<32x512xi32>
    %92 = arith.cmpi eq, %91, %90 : vector<32x512xi32>
    %93 = arith.extui %92 : vector<32x512xi1> to vector<32x512xi32>
    %94 = arith.sitofp %93 : vector<32x512xi32> to vector<32x512xf32>
    %c0_28 = arith.constant 0 : index
    %c0_29 = arith.constant 0 : index
    %95 = vector.load %arg9[%c0_28, %c0_29] : memref<512x128xf32, #tpu.memory_space<vmem>>, vector<512x128xf32>
    %cst_30 = arith.constant dense<0.000000e+00> : vector<512x128xf32>
    %96 = tpu.matmul %94, %24, %cst_30 {dimension_numbers = #tpu.dot_dimension_numbers<[0], [0], [1], [1], [0, 1, 1, 1], [], []>} : vector<32x512xf32>, vector<32x128xf32>, vector<512x128xf32> -> vector<512x128xf32>
    %97 = arith.addf %95, %96 : vector<512x128xf32>
    %c0_31 = arith.constant 0 : index
    %c0_32 = arith.constant 0 : index
    %98 = vector.load %arg9[%c0_31, %c0_32] : memref<512x128xf32, #tpu.memory_space<vmem>>, vector<512x128xf32>
    tpu.vector_store %arg9[%c0_31, %c0_32], %97 {strides = array<i32>} : memref<512x128xf32, #tpu.memory_space<vmem>>, vector<512x128xf32>,
    %c0_i32_33 = arith.constant 0 : i32
    %99 = arith.cmpi eq, %arg1, %c0_i32_33 : i32
    %100 = arith.extui %99 : i1 to i32
    %c0_i32_34 = arith.constant 0 : i32
    %101 = arith.cmpi ne, %100, %c0_i32_34 : i32
    scf.if %101 {
      %c0_35 = arith.constant 0 : index
      %c0_36 = arith.constant 0 : index
      %102 = vector.load %arg9[%c0_35, %c0_36] : memref<512x128xf32, #tpu.memory_space<vmem>>, vector<512x128xf32>
      %103 = vector.extract_strided_slice %102 {offsets = [0, 32], sizes = [512, 1], strides = [1, 1]} : vector<512x128xf32> to vector<512x1xf32>
      %cst_37 = arith.constant 1.000000e+00 : f32
      %104 = vector.broadcast %cst_37 : f32 to vector<512x1xf32>
      %105 = arith.maximumf %103, %104 : vector<512x1xf32>
      %106 = vector.broadcast %105 : vector<512x1xf32> to vector<512x128xf32>
      %107 = arith.divf %102, %106 : vector<512x128xf32>
      %c0_38 = arith.constant 0 : index
      %c0_39 = arith.constant 0 : index
      %108 = vector.load %arg9[%c0_38, %c0_39] : memref<512x128xf32, #tpu.memory_space<vmem>>, vector<512x128xf32>
      tpu.vector_store %arg9[%c0_38, %c0_39], %107 {strides = array<i32>} : memref<512x128xf32, #tpu.memory_space<vmem>>, vector<512x128xf32>,
    } else {
    }
    return
  }
  func.func @transform_0(%arg0: i32, %arg1: i32) -> i32 {
    %c0_i32 = arith.constant 0 : i32
    %c0_i32_0 = arith.constant 0 : i32
    return %c0_i32 : i32
  }
  func.func @transform_1(%arg0: i32, %arg1: i32) -> (i32, i32) {
    %c0_i32 = arith.constant 0 : i32
    %c0_i32_0 = arith.constant 0 : i32
    %c0_i32_1 = arith.constant 0 : i32
    return %c0_i32, %c0_i32_0 : i32, i32
  }
  func.func @transform_2(%arg0: i32, %arg1: i32) -> (i32, i32, i32) {
    %c0_i32 = arith.constant 0 : i32
    %c0_i32_0 = arith.constant 0 : i32
    return %arg0, %arg1, %c0_i32 : i32, i32, i32
  }
  func.func @transform_3(%arg0: i32, %arg1: i32) -> (i32, i32, i32) {
    %c0_i32 = arith.constant 0 : i32
    %c0_i32_0 = arith.constant 0 : i32
    return %arg0, %arg1, %c0_i32 : i32, i32, i32
  }
  func.func @transform_4(%arg0: i32, %arg1: i32) -> (i32, i32, i32) {
    %c0_i32 = arith.constant 0 : i32
    %c0_i32_0 = arith.constant 0 : i32
    return %arg0, %arg1, %c0_i32 : i32, i32, i32
  }
  func.func @transform_5(%arg0: i32, %arg1: i32) -> (i32, i32) {
    %c0_i32 = arith.constant 0 : i32
    %c0_i32_0 = arith.constant 0 : i32
    %c0_i32_1 = arith.constant 0 : i32
    return %c0_i32, %c0_i32_0 : i32, i32
  }
  func.func @transform_6(%arg0: i32, %arg1: i32) -> (i32, i32) {
    %c0_i32 = arith.constant 0 : i32
    %c0_i32_0 = arith.constant 0 : i32
    %c0_i32_1 = arith.constant 0 : i32
    return %c0_i32, %c0_i32_0 : i32, i32
  }
  func.func @transform_7(%arg0: i32, %arg1: i32) -> (i32, i32) {
    %c0_i32 = arith.constant 0 : i32
    %c0_i32_0 = arith.constant 0 : i32
    return %arg0, %c0_i32 : i32, i32
  }
}

</mosaic_0001>

<bundles_post_ra>
// kernel: squeeze.0
= control target key start
LH: loop header
LB: loop body
LE: loop exit
PB: predicated region body
PF: predicated region fallthrough
CT: control target
= control target key end

     0   :  { %vm21_vm0 = vcmask 7168   ;;  %s95_s16 = smov 127   ;;  %s96_s23 = smov 125   ;;  %s159_s0 = inlined_call_operand.vmem [shape: f32[2,2,4,4], index: 0, kind: input, shape index: {}]   ;;  %s160_s1 = inlined_call_operand.vmem [shape: f32[2,32,1], index: 1, kind: output, shape index: {}]  }
   0x1   :  { %v81_v0 = vld [vmem:[%s159_s0 + $0x4] sm:$0xf]  ;;  %v18_v1 = vld [vmem:[%s159_s0] sm:$0xf]  ;;  %v79_v2 = vld [vmem:[%s159_s0 + $0xc] sm:$0xf] }
   0x2   :  { %17 = vst [vmem:[#allocation0 + $0x8] sm:$0xf] %v81_v0  ;;  %19 = vst [vmem:[#allocation0] sm:$0xf] %v18_v1  ;;  %v80_v3 = vld [vmem:[%s159_s0 + $0x8] sm:$0xf] }
   0x3   :  { %8 = vst [vmem:[#allocation0 + $0x18] sm:$0xf] %v79_v2  ;;  %13 = vst [vmem:[#allocation0 + $0x10] sm:$0xf] %v80_v3  ;;  %s94_s0 = smov 126  }
   0x9   :  { %v51_v4 = vld.sshfl [vmem:[#allocation0] sm:$0xff pattern:$0xba983210]  }
   0xa   :  { %v20_v5 = vld [vmem:[#allocation0] sm:$0xf]   ;;  %52 = vrot.lane.b32.xlu1 %v51_v4, %s94_s0  ;;  %39 = vrot.lane.b32.xlu0 %v51_v4, %s95_s16  ;;  %v24_v6 = vld [vmem:[#allocation0 + $0x8] sm:$0xf]   ;;  %v29_v8 = vld [vmem:[#allocation0 + $0x10] sm:$0xf]  }
   0xb   :  { %22 = vst.msk [vmem:[%s160_s1] ss:$4 sm:$0xf] %vm21_vm0, %v20_v5   ;;  %v58_v7 = vld.sshfl [vmem:[#allocation0 + $0x10] sm:$0xff pattern:$0xba983210]  }
   0xc   :  { %82 = vst.msk [vmem:[%s160_s1 + $0x10] ss:$4 sm:$0xf] %vm21_vm0, %v24_v6   ;;  %v34_v9 = vld [vmem:[#allocation0 + $0x18] sm:$0xf]  }
   0xd   :  { %83 = vst.msk [vmem:[%s160_s1 + $0x20] ss:$4 sm:$0xf] %vm21_vm0, %v29_v8   ;;  %84 = vst.msk [vmem:[%s160_s1 + $0x30] ss:$4 sm:$0xf] %vm21_vm0, %v34_v9  }
   0xe   :  { %59 = vrot.lane.b32.xlu1 %v58_v7, %s94_s0  ;;  %46 = vrot.lane.b32.xlu0 %v58_v7, %s95_s16 }
  0x12   :  { %72 = vrot.lane.b32.xlu1 %v58_v7, %s96_s23  ;;  %65 = vrot.lane.b32.xlu0 %v51_v4, %s96_s23 }
  0x7c   :  { %v53_v10 = vpop.permute.xlu1 %52   ;;  %v40_v11 = vpop.permute.xlu0 %39  }
  0x7d   :  { %87 = vst.msk [vmem:[%s160_s1 + $0x2] ss:$4 sm:$0xff] %vm21_vm0, %v53_v10   ;;  %85 = vst.msk [vmem:[%s160_s1 + $0x1] ss:$4 sm:$0xff] %vm21_vm0, %v40_v11  }
  0x80   :  { %v60_v12 = vpop.permute.xlu1 %59   ;;  %v47_v13 = vpop.permute.xlu0 %46  }
  0x81   :  { %88 = vst.msk [vmem:[%s160_s1 + $0x22] ss:$4 sm:$0xff] %vm21_vm0, %v60_v12   ;;  %86 = vst.msk [vmem:[%s160_s1 + $0x21] ss:$4 sm:$0xff] %vm21_vm0, %v47_v13  }
  0x84   :  { %v73_v14 = vpop.permute.xlu1 %72   ;;  %v66_v15 = vpop.permute.xlu0 %65  }
  0x85   :  { %90 = vst.msk [vmem:[%s160_s1 + $0x23] ss:$4 sm:$0xff] %vm21_vm0, %v73_v14   ;;  %89 = vst.msk [vmem:[%s160_s1 + $0x3] ss:$4 sm:$0xff] %vm21_vm0, %v66_v15  }

// kernel: lift3d_forward.1
= control target key start
LH: loop header
LB: loop body
LE: loop exit
PB: predicated region body
PF: predicated region fallthrough
CT: control target
= control target key end

     0   :  { %s4393_s0 = inlined_call_operand.<no memory space> [shape: s32[1], index: 0, kind: input, shape index: {}]   ;;  %s4394_s1 = inlined_call_operand.vmem [shape: f32[2,3], index: 1, kind: input, shape index: {}]   ;;  %s4395_s2 = inlined_call_operand.vmem [shape: f32[2,32,48], index: 2, kind: input, shape index: {}]   ;;  %s4396_s3 = inlined_call_operand.vmem [shape: f32[2,32,3], index: 3, kind: input, shape index: {}]   ;;  %s4397_s4 = inlined_call_operand.vmem [shape: f32[2,32,1], index: 4, kind: input, shape index: {}]   ;;  %s4398_s5 = inlined_call_operand.vmem [shape: f32[48,128], index: 5, kind: input, shape index: {}]   ;;  %s4399_s6 = inlined_call_operand.vmem [shape: f32[1,128], index: 6, kind: input, shape index: {}]   ;;  %s4400_s7 = inlined_call_operand.hbm [shape: f32[1024,128], index: 7, kind: output, shape index: {}]  }
   0x1   :  { %12 = sst [smem:[#allocation2]] %s4393_s0 }
   0x2   :  { %13 = vsyncpa [#allocation5], 0 }
   0x3   :  { %14 = vsyncpa [#allocation4], 0 }
   0x4   :  { %16 = vsyncpa [#allocation4 + $0x1], 0  ;;  %s3506_s26 = smov 0   ;;  %s3508_s27 = smov 0  }
   0x5   :  { %s3510_s28 = smov 0   ;;  %s3512_s29 = smov 0  }
   0x6   :  { %s3514_s30 = smov 0   ;;  %s3516_s8 = smov 0  }
   0x7 LB: > { %s2579_s0 = sadd.s32 4294967295, %s3452_s8   ;;  %s2580_s9 = sadd.s32 4294967294, %s3452_s8   ;;  %s3452_s8 = sphi %s3516_s8, %s22_s8   ;;  %s3448_s30 = sphi %s3514_s30, %s4451_s30   ;;  %s3444_s29 = sphi %s3512_s29, %s4450_s29   ;;  %s3440_s28 = sphi %s3510_s28, %s4449_s28   ;;  %s3436_s27 = sphi %s3508_s27, %s4448_s27   ;;  %s3432_s26 = sphi %s3506_s26, %s4447_s26  }
   0x8   : > { %s34_s10 = sadd.s32 1, %s3448_s30  ;;  %s209_s11 = sadd.s32 1, %s3440_s28 }
   0x9   : > { %p36_p0 = scmp.ge.s32.totalorder %s34_s10, 2  ;;  %p219_p1 = scmp.ne.s32.totalorder %s3440_s28, %s3436_s27 }
   0xa   : > { %p220_p2 = scmp.eq.s32.totalorder %s2579_s0, 1  ;;  %p225_p3 = scmp.ne.s32.totalorder %s3436_s27, %s3432_s26 }
   0xb   : > { %s4453_s10 = smov (%p36_p0, %s34_s10), 0  ;;  %p226_p5 = scmp.eq.s32.totalorder %s2580_s9, 1 }
   0xc   : > { %p3546_p4 = por %p220_p2, %p219_p1  ;;  %s206_s13 = ssub.s32 %s3448_s30, %s4453_s10 }
   0xd   : > { %p2581_p6 = scmp.ge.s32.totalorder %s3452_s8, 1  ;;  %p207_p7 = scmp.eq.s32.totalorder %s206_s13, 0 }
   0xe   : > { %p3553_p8 = por %p226_p5, %p225_p3  ;;  %p233_p9 = scmp.lt.s32.totalorder %s3452_s8, 3 }
   0xf   : > { %s3559_s15 = scalar_select %p207_p7, %s3440_s28, %s209_s11  }
  0x10   : > { %p3561_p10 = pnand %p2581_p6, %p233_p9  ;;  %p3565_p11 = scmp.eq.s32.totalorder %s2579_s0, 0 }
  0x11   : > { %s249_s20 = sshll.u32 %s4394_s1, 4  ;;  %s250_s20 = int_to_ptr.vmem [resolvable:$true] %s249_s20 }
  0x12   : > { %p2974_p12 = pneg %p3561_p10  ;;  %s3355_s21 = scalar_lea.vmem %s250_s20, 32 }
  0x13   : > { %p3356_p0 = scmp.ne.s32.totalorder %s250_s20, %s3355_s21  ;;  %p3363_p5 = scmp.lt.s32.totalorder %s250_s20, %s250_s20 }
  0x14   : > { %p2975_p13 = pnand %p3565_p11, %p2974_p12  ;;  %p3364_p6 = scmp.lt.s32.totalorder %s3355_s21, %s3355_s21 }
  0x16   : > { %p3357_p1 = pneg %p2975_p13  ;;  %p3365_p7 = por %p3364_p6, %p3363_p5 }
  0x18   : > { %p3358_p2 = pnand %p3357_p1, %p3356_p0 }
  0x1a   : > { %p3359_p3 = pneg %p3358_p2 }
  0x1c   : > { %p3366_p9 = pnand %p3365_p7, %p3359_p3 }
  0x1e   : > { %3369 = shalt.err (!%p3366_p9)
}
  0x1f   : > { %s3454_s22 = smov [#allocation3]   ;;  %307 = sbr.rel (%p3561_p10) target bundleno = 1008 (0x3f0), region = 48 }
  0x20   : > { %2977 = dma.vmem_to_smem (!%p2975_p13), %s250_s20, 32, %s3454_s22, [#allocation5]  }
  0x26   : > { %3423 = dma.done.wait (%p3565_p11), [#allocation5], 32  }
  0x27   : > { %3425 = vsyncadd (%p3565_p11), [#allocation5], 4294967264 }
  0x28   : > { %313 = sfence }
  0x29   : > { %p363_p12 = scmp.lt.s32.totalorder %s3444_s29, 1  ;;  %s2598_s23 = sshll.u32 %s3444_s29, 7  ;;  %v3455_v0 = vmov 0  }
  0x2a   : > { %s614_s24 = sld [smem:[#allocation3 + %s2598_s23]]  ;;  %s617_s25 = sadd.s32 2, %s2598_s23  ;;  %3041 = vset.pattern.permute.xlu0 %v3455_v0  ;;  %3042 = vset.pattern.permute.xlu1 %v3455_v0 }
  0x2b   : > { %s364_s0 = scalar_select %p363_p12, %s3444_s29, 1 }
  0x2c   : > { %s618_s9 = sld [smem:[#allocation3 + %s617_s25]]  ;;  %s615_s13 = sadd.s32 1, %s2598_s23 }
  0x2d   : > { %s3587_s11 = sshll.u32 %s364_s0, 5  ;;  %s616_s16 = sld [smem:[#allocation3 + %s615_s13]] }
  0x2e   : > { %s3593_s19 = scalar_lea.vmem %s4396_s3, %s3587_s11  ;;  %s3456_s23 = smov 126  }
  0x2f   : > { %v465_v2 = vld [vmem:[%s3593_s19] sm:$0xff]  ;;  %v466_v6 = vld [vmem:[%s3593_s19 + $0x8] sm:$0xff]  ;;  %v467_v12 = vld [vmem:[%s3593_s19 + $0x10] sm:$0xff]  ;;  %s3696_s17 = scalar_lea.vmem %s4397_s4, %s3587_s11 }
  0x30   : > { %s619_s20 = smul.f32 0.5, %s614_s24  ;;  %v625_v1 = vstv %s614_s24  ;;  %v468_v34 = vld [vmem:[%s3593_s19 + $0x18] sm:$0xff]  ;;  %s3457_s24 = smov 127  }
  0x31   : > { %3221 = vrcp.f32 %v625_v1  ;;  %s359_s19 = sand.u32 1, %s3436_s27  }
  0x32   : > { %v3596_v3 = vstv %s619_s20  ;;  %v665_v4 = vstv %s618_s9  ;;  %s659_s21 = smul.f32 0.5, %s618_s9  ;;  %s370_s20 = scalar_lea.vmem %s4395_s2, %s3587_s11 }
  0x33   : > { %3223 = vrcp.f32 %v665_v4  ;;  %v621_v5 = vsub.f32 %v465_v2, %v3596_v3  ;;  %v645_v7 = vstv %s616_s16  ;;  %v622_v8 = vsub.f32 %v466_v6, %v3596_v3  ;;  %s639_s22 = smul.f32 0.5, %s616_s16 }
  0x34   : > { %3225 = vrcp.f32 %v645_v7  ;;  %v3601_v9 = vstv %s659_s21  ;;  %v623_v48 = vsub.f32 %v467_v12, %v3596_v3  ;;  %v624_v49 = vsub.f32 %v468_v34, %v3596_v3 }
  0x35   : > { %v640_v10 = vstv %s639_s22  ;;  %v661_v11 = vsub.f32 %v465_v2, %v3601_v9  ;;  %v662_v26 = vsub.f32 %v466_v6, %v3601_v9  ;;  %v663_v40 = vsub.f32 %v467_v12, %v3601_v9  ;;  %s2703_s22 = sshll.u32 %s3444_s29, 13  ;;  %s4347_s29 = scalar_lea.sflag [#allocation4], %s359_s19 }
  0x36   : > { %v642_v14 = vsub.f32 %v466_v6, %v640_v10  ;;  %v641_v15 = vsub.f32 %v465_v2, %v640_v10  ;;  %v643_v19 = vsub.f32 %v467_v12, %v640_v10  ;;  %v644_v39 = vsub.f32 %v468_v34, %v640_v10  ;;  %v473_v10 = vld [vmem:[%s4398_s5] sm:$0xff]  ;;  %v475_v12 = vld [vmem:[%s4398_s5 + $0x10] sm:$0xff]  ;;  %s4338_s13 = scalar_lea.hbm %s4400_s7, %s2703_s22 }
  0x37   : > { %v664_v60 = vsub.f32 %v468_v34, %v3601_v9 }
  0x3b   : > { %v3222_v13 = vpop.eup %3221 }
  0x3c   : > { %v3605_v16 = vmul.f32 %v3222_v13, %v622_v8  ;;  %v3607_v17 = vmul.f32 %v3222_v13, %v621_v5  ;;  %v3633_v53 = vmul.f32 %v3222_v13, %v623_v48  ;;  %v3635_v55 = vmul.f32 %v3222_v13, %v624_v49 }
  0x3d   : > { %v3609_v18 = vpop.eup %3223 }
  0x3e   : > { %v667_v20 = vmul.f32 %v3609_v18, %v661_v11  ;;  %v3226_v21 = vpop.eup %3225  ;;  %v668_v33 = vmul.f32 %v3609_v18, %v662_v26  ;;  %v669_v45 = vmul.f32 %v3609_v18, %v663_v40  ;;  %v670_v63 = vmul.f32 %v3609_v18, %v664_v60  ;;  %v474_v11 = vld [vmem:[%s4398_s5 + $0x8] sm:$0xff] }
  0x3f   : > { %v648_v23 = vmul.f32 %v3226_v21, %v642_v14  ;;  %v647_v24 = vmul.f32 %v3226_v21, %v641_v15  ;;  %v649_v25 = vmul.f32 %v3226_v21, %v643_v19  ;;  %v650_v47 = vmul.f32 %v3226_v21, %v644_v39  ;;  %v477_v14 = vld [vmem:[%s4398_s5 + $0x20] sm:$0xff]  ;;  %v478_v19 = vld [vmem:[%s4398_s5 + $0x28] sm:$0xff] }
  0x40   : > { %v2958_v22 = vcvt.f32.s32 %v667_v20  ;;  %v2961_v42 = vcvt.f32.s32 %v668_v33  ;;  %v2964_v52 = vcvt.f32.s32 %v669_v45  ;;  %v2967_v3 = vcvt.f32.s32 %v670_v63  ;;  %v461_v20 = vld [vmem:[%s370_s20] sm:$0xff] }
  0x41   : > { %v2949_v28 = vcvt.f32.s32 %v648_v23  ;;  %v2946_v29 = vcvt.f32.s32 %v647_v24  ;;  %v2952_v32 = vcvt.f32.s32 %v649_v25  ;;  %v2955_v54 = vcvt.f32.s32 %v650_v47  ;;  %v463_v23 = vld [vmem:[%s370_s20 + $0x10] sm:$0xff]  ;;  %v464_v24 = vld [vmem:[%s370_s20 + $0x18] sm:$0xff]  ;;  %v469_v33 = vld [vmem:[%s3696_s17] sm:$0xff] }
  0x42   : > { %v2607_v27 = vadd.s32 4, %v2958_v22  ;;  %v2608_v46 = vadd.s32 4, %v2961_v42  ;;  %v2609_v59 = vadd.s32 4, %v2964_v52  ;;  %v2610_v6 = vadd.s32 4, %v2967_v3  ;;  %v462_v22 = vld [vmem:[%s370_s20 + $0x8] sm:$0xff]  ;;  %s2586_s20 = sshll.u32 %s359_s19, 9 }
  0x43   : > { %v2604_v30 = vadd.s32 4, %v2949_v28  ;;  %v2603_v31 = vadd.s32 4, %v2946_v29  ;;  %v2605_v41 = vadd.s32 4, %v2952_v32  ;;  %v2606_v58 = vadd.s32 4, %v2955_v54  ;;  %s4204_s21 = scalar_lea.vmem [#allocation6], %s2586_s20 }
  0x44   : > { %819 = vrot.lane.b32.xlu0 %v2607_v27, %s3456_s23  ;;  %vm739_vm2 = vcmp.ge.s32.totalorder %v2607_v27, 0  ;;  %vm763_vm4 = vcmp.lt.s32.totalorder %v2607_v27, 8  ;;  %vm740_vm8 = vcmp.ge.s32.totalorder %v2608_v46, 0  ;;  %vm764_vm9 = vcmp.lt.s32.totalorder %v2608_v46, 8  ;;  %s2455_s25 = sshll.u32 %s4204_s21, 4  ;;  %s4340_s25 = int_to_ptr.vmem [resolvable:$true] %s2455_s25 }
  0x45   : > { %vm692_vm0 = vcmp.ge.s32.totalorder %v2604_v30, 0  ;;  %vm691_vm1 = vcmp.ge.s32.totalorder %v2603_v31, 0  ;;  %vm715_vm3 = vcmp.lt.s32.totalorder %v2603_v31, 8  ;;  %v743_v37 = vsel %vm739_vm2, 1, %v3455_v0 }
  0x46   : > { %v696_v35 = vsel %vm692_vm0, 1, %v3455_v0  ;;  %v695_v36 = vsel %vm691_vm1, 1, %v3455_v0  ;;  %v719_v38 = vsel %vm715_vm3, 1, %v3455_v0  ;;  %vm716_vm5 = vcmp.lt.s32.totalorder %v2604_v30, 8 }
  0x47   : > { %701 = vrot.lane.b32.xlu1 %v696_v35, %s3457_s24  ;;  %v767_v43 = vsel %vm763_vm4, 1, %v3455_v0  ;;  %v720_v44 = vsel %vm716_vm5, 1, %v3455_v0  ;;  %vm693_vm6 = vcmp.ge.s32.totalorder %v2605_v41, 0  ;;  %v803_v50 = vmul.u32 8, %v2603_v31 }
  0x48   : > { %699 = vrot.lane.b32.xlu0 %v695_v36, %s3457_s24  ;;  %v697_v51 = vsel %vm693_vm6, 1, %v3455_v0  ;;  %vm717_vm7 = vcmp.lt.s32.totalorder %v2605_v41, 8  ;;  %v744_v57 = vsel %vm740_vm8, 1, %v3455_v0  ;;  %v804_v61 = vmul.u32 8, %v2604_v30 }
  0x49   : > { %v721_v56 = vsel %vm717_vm7, 1, %v3455_v0  ;;  %v768_v62 = vsel %vm764_vm9, 1, %v3455_v0  ;;  %vm694_vm10 = vcmp.ge.s32.totalorder %v2606_v58, 0  ;;  %vm741_vm11 = vcmp.ge.s32.totalorder %v2609_v59, 0 }
  0x4a   : > { %v698_v1 = vsel %vm694_vm10, 1, %v3455_v0  ;;  %v745_v2 = vsel %vm741_vm11, 1, %v3455_v0  ;;  %vm718_vm12 = vcmp.lt.s32.totalorder %v2606_v58, 8  ;;  %vm765_vm13 = vcmp.lt.s32.totalorder %v2609_v59, 8 }
  0x4b   : > { %747 = vrot.lane.b32.xlu1 %v743_v37, %s3456_s23  ;;  %v722_v4 = vsel %vm718_vm12, 1, %v3455_v0  ;;  %v769_v5 = vsel %vm765_vm13, 1, %v3455_v0  ;;  %v805_v7 = vmul.u32 8, %v2605_v41  ;;  %vm742_vm14 = vcmp.ge.s32.totalorder %v2610_v6, 0 }
  0x4c   : > { %723 = vrot.lane.b32.xlu0 %v719_v38, %s3457_s24  ;;  %vm766_vm15 = vcmp.lt.s32.totalorder %v2610_v6, 8  ;;  %v746_v8 = vsel %vm742_vm14, 1, %v3455_v0  ;;  %vm486_vm0 = vcmask 392192   ;;  %v2904_v13 = vpack.c.bf16 %v474_v11, %v473_v10 }
  0x4d   : > { %v770_v9 = vsel %vm766_vm15, 1, %v3455_v0  ;;  %v476_v0 = vld [vmem:[%s4398_s5 + $0x18] sm:$0xff]  ;;  %v806_v15 = vmul.u32 8, %v2606_v58  ;;  %2794 = vmatprep.mubr.msk.f32.mxu0 %vm486_vm0, %v461_v20  ;;  %v2912_v21 = vpack.c.bf16 %v478_v19, %v477_v14  ;;  %v2934_v25 = vcvt.f32.s32 %v3607_v17 }
  0x4e   : > { %v2908_v18 = vpack.c.bf16 %v476_v0, %v475_v12  ;;  %2905 = vmatprep.subr.bf16.mxu0 %v2904_v13  ;;  %v2937_v30 = vcvt.f32.s32 %v3605_v16  ;;  %v585_v17 = vlaneseq  ;;  %v2940_v34 = vcvt.f32.s32 %v3633_v53 }
  0x4f   : > { %771 = vrot.lane.b32.xlu1 %v767_v43, %s3456_s23  ;;  %2907 = vmatpush3.bf16.msra.mxu0 %v2904_v13  ;;  %v2599_v26 = vadd.s32 4, %v2934_v25  ;;  %vm787_vm11 = vcmp.gt.f32.partialorder %v469_v33, 0.0  ;;  %v2943_v49 = vcvt.f32.s32 %v3635_v55 }
  0x50   : > { %725 = vrot.lane.b32.xlu0 %v720_v44, %s3457_s24  ;;  %2909 = vmatprep.subr.bf16.mxu0 %v2908_v18  ;;  %v2600_v35 = vadd.s32 4, %v2937_v30  ;;  %v3702_v39 = vshrl.u32 %v585_v17, 7  ;;  %v3706_v40 = vadd.s32 4, %v2940_v34  ;;  %v3776_v25 = vand.u32 127, %v585_v17  ;;  %v2593_v30 = vld [vmem:[%s4399_s6] ss:$0 sm:$0xff] }
  0x51   : > { %vm679_vm1 = vcmp.ge.s32.totalorder %v2599_v26, 0  ;;  %vm683_vm2 = vcmp.lt.s32.totalorder %v2599_v26, 8  ;;  %v799_v38 = vmul.u32 64, %v2599_v26  ;;  %v2602_v54 = vadd.s32 4, %v2943_v49 }
  0x52   : > { %vm687_vm3 = vmand %vm679_vm1, %vm683_vm2  ;;  %vm680_vm13 = vcmp.ge.s32.totalorder %v2600_v35, 0  ;;  %vm684_vm14 = vcmp.lt.s32.totalorder %v2600_v35, 8  ;;  %vm681_vm2 = vcmp.ge.s32.totalorder %v3706_v40, 0  ;;  %v587_v58 = vadd.s32 8, %v3702_v39 }
  0x53   : > { %703 = vrot.lane.b32.xlu1 %v697_v51, %s3457_s24  ;;  %2911 = vmatpush3.bf16.msra.mxu0 %v2908_v18  ;;  %vm3710_vm1 = vmand %vm680_vm13, %vm684_vm14  ;;  %v800_v60 = vmul.u32 64, %v2600_v35  ;;  %v802_v12 = vmul.u32 64, %v2602_v54  ;;  %v589_v0 = vadd.s32 24, %v3702_v39  ;;  %v3779_v26 = vadd.s32 128, %v3776_v25 }
  0x54   : > { %807 = vrot.lane.b32.xlu0 %v803_v50, %s3457_s24  ;;  %2913 = vmatprep.subr.bf16.mxu0 %v2912_v21  ;;  %v470_v50 = vld [vmem:[%s3696_s17 + $0x8] sm:$0xff] }
  0x57   : > { %727 = vrot.lane.b32.xlu1 %v721_v56, %s3457_s24  ;;  %2915 = vmatpush3.bf16.msra.mxu0 %v2912_v21 }
  0x58   : > { %749 = vrot.lane.b32.xlu0 %v744_v57, %s3456_s23 }
  0x5a   : > { %2795 = vmatmul.mubr.msk.f32.vlgmr.msra.gmra.mrb[0].mxu0 %vm486_vm0, %v462_v22 }
  0x5b   : > { %809 = vrot.lane.b32.xlu1 %v804_v61, %s3457_s24  ;;  %2797 = vmatprep.mubr.msk.f32.mxu0 %vm486_vm0, %v463_v23 }
  0x5c   : > { %773 = vrot.lane.b32.xlu0 %v768_v62, %s3456_s23 }
  0x5e   : > { %2798 = vmatmul.mubr.msk.f32.gmra.mrb[2].mxu0 %vm486_vm0, %v464_v24 }
  0x5f   : > { %705 = vrot.lane.b32.xlu1 %v698_v1, %s3457_s24 }
  0x60   : > { %751 = vrot.lane.b32.xlu0 %v745_v2, %s3456_s23 }
  0x63   : > { %729 = vrot.lane.b32.xlu1 %v722_v4, %s3457_s24 }
  0x64   : > { %775 = vrot.lane.b32.xlu0 %v769_v5, %s3456_s23 }
  0x67   : > { %811 = vrot.lane.b32.xlu1 %v805_v7, %s3457_s24  ;;  %v801_v7 = vmul.u32 64, %v3706_v40 }
  0x68   : > { %821 = vrot.lane.b32.xlu0 %v2608_v46, %s3456_s23 }
  0x6b   : > { %753 = vrot.lane.b32.xlu1 %v746_v8, %s3456_s23 }
  0x6c   : > { %777 = vrot.lane.b32.xlu0 %v770_v9, %s3456_s23  ;;  %v3753_v9 = vadd.s32 16, %v3702_v39 }
  0x6f   : > { %813 = vrot.lane.b32.xlu1 %v806_v15, %s3457_s24  ;;  %s3460_s24 = smov [#allocation6]  }
  0x70   : > { %823 = vrot.lane.b32.xlu0 %v2609_v59, %s3456_s23  ;;  %v471_v59 = vld [vmem:[%s3696_s17 + $0x10] sm:$0xff]  ;;  %s3374_s16 = sshll.u32 %s3460_s24, 4  ;;  %s3375_s16 = int_to_ptr.vmem [resolvable:$false] %s3374_s16 }
  0x71   : > { %p3377_p0 = scmp.lt.s32.totalorder %s4340_s25, %s3375_s16 }
  0x73   : > { %825 = vrot.lane.b32.xlu1 %v2610_v6, %s3456_s23  ;;  %s595_s23 = sld [smem:[#allocation2]]  ;;  %v472_v6 = vld [vmem:[%s3696_s17 + $0x18] sm:$0xff]  ;;  %s3376_s17 = scalar_lea.vmem %s3375_s16, 16384 }
  0x79   : > { %v3704_v16 = vstv %s595_s23  ;;  %s3370_s23 = scalar_lea.vmem %s4340_s25, 8192 }
  0x7a   : > { %vm597_vm0 = vcmp.lt.s32.totalorder %v3702_v39, %v3704_v16  ;;  %p3371_p10 = scmp.ne.s32.totalorder %s4340_s25, %s3370_s23  ;;  %p3378_p1 = scmp.lt.s32.totalorder %s3376_s17, %s3370_s23 }
  0x7c   : > { %p3372_p11 = pnand %p3371_p10, %p3546_p4  ;;  %p3379_p2 = por %p3378_p1, %p3377_p0 }
  0x7e   : > { %p3373_p13 = pneg %p3372_p11 }
  0x80   : > { %p3380_p3 = pnand %p3379_p2, %p3373_p13 }
  0xb6   : > { %v820_v27 = vpop.permute.xlu0 %819 }
  0xb9   : > { %v702_v28 = vpop.permute.xlu1 %701 }
  0xba   : > { %v700_v29 = vpop.permute.xlu0 %699 }
  0xbb   : > { %vm707_vm4 = vcmp.ne.s32.totalorder %v700_v29, 0 }
  0xbc   : > { %vm711_vm5 = vmand %vm687_vm3, %vm707_vm4  ;;  %vm685_vm3 = vcmp.lt.s32.totalorder %v3706_v40, 8  ;;  %vm708_vm4 = vcmp.ne.s32.totalorder %v702_v28, 0  ;;  %v3785_v28 = vadd.s32 384, %v3776_v25 }
  0xbd   : > { %v748_v31 = vpop.permute.xlu1 %747 }
  0xbe   : > { %v724_v32 = vpop.permute.xlu0 %723  ;;  %vm755_vm6 = vcmp.ne.s32.totalorder %v748_v31, 0 }
  0xbf   : > { %vm731_vm7 = vcmp.ne.s32.totalorder %v724_v32, 0  ;;  %v3458_v32 = vmov 0.0  }
  0xc0   : > { %vm735_vm8 = vmand %vm711_vm5, %vm731_vm7 }
  0xc1   : > { %vm759_vm9 = vmand %vm735_vm8, %vm755_vm6  ;;  %v772_v36 = vpop.permute.xlu1 %771 }
  0xc2   : > { %v726_v37 = vpop.permute.xlu0 %725  ;;  %vm779_vm10 = vcmp.ne.s32.totalorder %v772_v36, 0  ;;  %vm3721_vm7 = vmand %vm681_vm2, %vm685_vm3  ;;  %vm682_vm2 = vcmp.ge.s32.totalorder %v2602_v54, 0  ;;  %vm686_vm3 = vcmp.lt.s32.totalorder %v2602_v54, 8 }
  0xc3   : > { %vm783_vm12 = vmand %vm759_vm9, %vm779_vm10  ;;  %vm732_vm6 = vcmp.ne.s32.totalorder %v726_v37, 0 }
  0xc4   : > { %vm791_vm15 = vmand %vm783_vm12, %vm787_vm11  ;;  %vm788_vm11 = vcmp.gt.f32.partialorder %v470_v50, 0.0 }
  0xc5   : > { %v704_v41 = vpop.permute.xlu1 %703  ;;  %vm795_vm5 = vmand %vm791_vm15, %vm597_vm0 }
  0xc6   : > { %v808_v42 = vpop.permute.xlu0 %807  ;;  %vm712_vm9 = vmand %vm3710_vm1, %vm708_vm4  ;;  %vm709_vm15 = vcmp.ne.s32.totalorder %v704_v41, 0 }
  0xc7   : > { %v815_v43 = vadd.s32 %v808_v42, %v799_v38  ;;  %vm736_vm10 = vmand %vm712_vm9, %vm732_vm6 }
  0xc8   : > { %vm713_vm1 = vmand %vm3721_vm7, %vm709_vm15 }
  0xc9   : > { %v827_v45 = vadd.s32 %v820_v27, %v815_v43  ;;  %v728_v46 = vpop.permute.xlu1 %727  ;;  %v3782_v27 = vadd.s32 256, %v3776_v25 }
  0xca   : > { %v750_v47 = vpop.permute.xlu0 %749  ;;  %vm733_vm4 = vcmp.ne.s32.totalorder %v728_v46, 0 }
  0xcb   : > { %v831_v48 = vsel %vm795_vm5, %v827_v45, 4294967295  ;;  %vm756_vm8 = vcmp.ne.s32.totalorder %v750_v47, 0  ;;  %vm737_vm9 = vmand %vm713_vm1, %vm733_vm4 }
  0xcc   : > { %841 = vperm.xlu0 %3041, %v831_v48   ;;  %vm760_vm12 = vmand %vm736_vm10, %vm756_vm8 }
  0xcd   : > { %v810_v52 = vpop.permute.xlu1 %809  ;;  %vm3735_vm8 = vmand %vm682_vm2, %vm686_vm3 }
  0xce   : > { %v774_v53 = vpop.permute.xlu0 %773  ;;  %v816_v1 = vadd.s32 %v810_v52, %v800_v60 }
  0xcf   : > { %vm780_vm13 = vcmp.ne.s32.totalorder %v774_v53, 0 }
  0xd0   : > { %vm784_vm14 = vmand %vm760_vm12, %vm780_vm13  ;;  %vm598_vm13 = vcmp.lt.s32.totalorder %v587_v58, %v3704_v16 }
  0xd1   : > { %vm3727_vm5 = vmand %vm784_vm14, %vm788_vm11  ;;  %v706_v56 = vpop.permute.xlu1 %705  ;;  %vm789_vm11 = vcmp.gt.f32.partialorder %v471_v59, 0.0 }
  0xd2   : > { %v752_v57 = vpop.permute.xlu0 %751  ;;  %vm710_vm7 = vcmp.ne.s32.totalorder %v706_v56, 0  ;;  %vm796_vm2 = vmand %vm3727_vm5, %vm598_vm13 }
  0xd3   : > { %vm757_vm6 = vcmp.ne.s32.totalorder %v752_v57, 0  ;;  %vm714_vm3 = vmand %vm3735_vm8, %vm710_vm7  ;;  %vm599_vm8 = vcmp.lt.s32.totalorder %v3753_v9, %v3704_v16 }
  0xd4   : > { %vm761_vm12 = vmand %vm737_vm9, %vm757_vm6 }
  0xd5   : > { %v730_v62 = vpop.permute.xlu1 %729 }
  0xd6   : > { %v776_v63 = vpop.permute.xlu0 %775  ;;  %vm734_vm1 = vcmp.ne.s32.totalorder %v730_v62, 0 }
  0xd7   : > { %vm781_vm10 = vcmp.ne.s32.totalorder %v776_v63, 0  ;;  %vm738_vm4 = vmand %vm714_vm3, %vm734_vm1 }
  0xd8   : > { %vm785_vm14 = vmand %vm761_vm12, %vm781_vm10  ;;  %vm790_vm10 = vcmp.gt.f32.partialorder %v472_v6, 0.0 }
  0xd9   : > { %v812_v2 = vpop.permute.xlu1 %811  ;;  %vm3740_vm15 = vmand %vm785_vm14, %vm789_vm11  ;;  %vm600_vm14 = vcmp.lt.s32.totalorder %v589_v0, %v3704_v16 }
  0xda   : > { %v822_v3 = vpop.permute.xlu0 %821  ;;  %v817_v13 = vadd.s32 %v812_v2, %v801_v7  ;;  %vm797_vm7 = vmand %vm3740_vm15, %vm599_vm8 }
  0xdb   : > { %v828_v5 = vadd.s32 %v822_v3, %v816_v1  ;;  %vm3771_vm3 = vmpackc.low %vm598_vm13, %vm597_vm0 }
  0xdd   : > { %v832_v8 = vsel %vm796_vm2, %v828_v5, 4294967295  ;;  %v754_v10 = vpop.permute.xlu1 %753 }
  0xde   : > { %844 = vperm.xlu1 %3042, %v832_v8   ;;  %v778_v11 = vpop.permute.xlu0 %777  ;;  %vm758_vm6 = vcmp.ne.s32.totalorder %v754_v10, 0 }
  0xdf   : > { %vm782_vm9 = vcmp.ne.s32.totalorder %v778_v11, 0  ;;  %vm762_vm5 = vmand %vm738_vm4, %vm758_vm6 }
  0xe0   : > { %vm786_vm11 = vmand %vm762_vm5, %vm782_vm9 }
  0xe1   : > { %v814_v14 = vpop.permute.xlu1 %813  ;;  %vm794_vm12 = vmand %vm786_vm11, %vm790_vm10 }
  0xe2   : > { %v824_v15 = vpop.permute.xlu0 %823  ;;  %v818_v18 = vadd.s32 %v814_v14, %v802_v12  ;;  %vm798_vm2 = vmand %vm794_vm12, %vm600_vm14 }
  0xe3   : > { %v829_v19 = vadd.s32 %v824_v15, %v817_v13  ;;  %vm2923_vm5 = vmpackc.low %vm600_vm14, %vm599_vm8 }
  0xe5   : > { %v833_v20 = vsel %vm797_vm7, %v829_v19, 4294967295  ;;  %v826_v21 = vpop.permute.xlu1 %825 }
  0xe6   : > { %847 = vperm.xlu1 %3042, %v833_v20   ;;  %v830_v22 = vadd.s32 %v826_v21, %v818_v18 }
  0xe8   : > { %v834_v23 = vsel %vm798_vm2, %v830_v22, 4294967295 }
  0xe9   : > { %850 = vperm.xlu0 %3041, %v834_v23  }
 0x12d   : > { %v2796_v31 = vpop.f32.mrb[0].mxu0 }
 0x12e   : > { %v565_v36 = vpop.f32.mrb[1].mxu0  ;;  %v571_v39 = vadd.f32 %v2796_v31, %v2593_v30 }
 0x12f   : > { %v566_v40 = vadd.f32 %v2593_v30, %v565_v36 }
 0x131   : > { %v2916_v41 = vpack.c.bf16 %v571_v39, %v566_v40  ;;  %v2799_v42 = vpop.f32.mrb[2].mxu0 }
 0x132   : > { %v581_v43 = vadd.f32 %v2799_v42, %v2593_v30  ;;  %v575_v44 = vpop.f32.mrb[3].mxu0 }
 0x133   : > { %v576_v45 = vadd.f32 %v2593_v30, %v575_v44  ;;  %2918 = vmatprep.subr.msk.bf16.mxu0 %vm3771_vm3, %v2916_v41  ;;  %2928 = vmatprep.subr.msk.bf16.mxu1 %vm3771_vm3, %v2916_v41 }
 0x134   : > { %2921 = vmatpush3.bf16.msk.msra.mxu0 %vm3771_vm3, %v2916_v41  ;;  %2930 = vmatpush3.bf16.msk.msra.mxu1 %vm3771_vm3, %v2916_v41 }
 0x135   : > { %v2922_v46 = vpack.c.bf16 %v581_v43, %v576_v45 }
 0x137   : > { %2924 = vmatprep.subr.msk.bf16.mxu0 %vm2923_vm5, %v2922_v46  ;;  %2929 = vmatprep.subr.msk.bf16.mxu1 %vm2923_vm5, %v2922_v46 }
 0x138   : > { %2927 = vmatpush3.bf16.msk.msra.mxu0 %vm2923_vm5, %v2922_v46  ;;  %2931 = vmatpush3.bf16.msk.msra.mxu1 %vm2923_vm5, %v2922_v46 }
 0x14b   : > { %v842_v29 = vpop.permute.xlu0 %841 }
 0x14c   : > { %vm853_vm0 = vcmp.eq.s32.totalorder %v842_v29, %v3779_v26  ;;  %vm854_vm13 = vcmp.eq.s32.totalorder %v842_v29, %v3782_v27  ;;  %vm852_vm15 = vcmp.eq.s32.totalorder %v842_v29, %v3776_v25  ;;  %vm855_vm1 = vcmp.eq.s32.totalorder %v842_v29, %v3785_v28 }
 0x14d   : > { %v2612_v17 = vsel %vm853_vm0, 1.0, %v3458_v32  ;;  %v2613_v33 = vsel %vm854_vm13, 1.0, %v3458_v32  ;;  %v2611_v34 = vsel %vm852_vm15, 1.0, %v3458_v32  ;;  %v2614_v35 = vsel %vm855_vm1, 1.0, %v3458_v32 }
 0x14e   : > { %v3043_v37 = vpack.i.bf16 %v2613_v33, %v2612_v17  ;;  %v3131_v38 = vpack.i.bf16 %v2614_v35, %v2611_v34  ;;  %vm1092_vm13 = vcmask 261120  }
 0x150   : > { %3044 = vxpose.xlu1.b32.start [1/4] (short) %v3043_v37, 128  ;;  %3132 = vxpose.xlu0.b32.start [1/4] (short) %v3131_v38, 128 }
 0x15d   : > { %v845_v47 = vpop.permute.xlu1 %844 }
 0x15e   : > { %vm856_vm4 = vcmp.eq.s32.totalorder %v845_v47, %v3776_v25  ;;  %vm857_vm6 = vcmp.eq.s32.totalorder %v845_v47, %v3779_v26  ;;  %vm858_vm9 = vcmp.eq.s32.totalorder %v845_v47, %v3782_v27  ;;  %vm859_vm10 = vcmp.eq.s32.totalorder %v845_v47, %v3785_v28 }
 0x15f   : > { %v2616_v48 = vsel %vm857_vm6, 1.0, %v3458_v32  ;;  %v2617_v49 = vsel %vm858_vm9, 1.0, %v3458_v32  ;;  %v2615_v50 = vsel %vm856_vm4, 1.0, %v3458_v32  ;;  %v2618_v51 = vsel %vm859_vm10, 1.0, %v3458_v32 }
 0x160   : > { %v3045_v52 = vpack.i.bf16 %v2617_v49, %v2616_v48  ;;  %v3133_v53 = vpack.i.bf16 %v2618_v51, %v2615_v50 }
 0x162   : > { %3046 = vxpose.xlu1.b32.cont [2/4] (short) %v3045_v52, 128  ;;  %3134 = vxpose.xlu0.b32.cont [2/4] (short) %v3133_v53, 128 }
 0x165   : > { %v848_v54 = vpop.permute.xlu1 %847 }
 0x166   : > { %vm860_vm11 = vcmp.eq.s32.totalorder %v848_v54, %v3776_v25  ;;  %vm861_vm12 = vcmp.eq.s32.totalorder %v848_v54, %v3779_v26  ;;  %vm862_vm7 = vcmp.eq.s32.totalorder %v848_v54, %v3782_v27  ;;  %vm863_vm2 = vcmp.eq.s32.totalorder %v848_v54, %v3785_v28 }
 0x167   : > { %v2619_v55 = vsel %vm860_vm11, 1.0, %v3458_v32  ;;  %v2620_v56 = vsel %vm861_vm12, 1.0, %v3458_v32  ;;  %v2621_v57 = vsel %vm862_vm7, 1.0, %v3458_v32  ;;  %v2622_v58 = vsel %vm863_vm2, 1.0, %v3458_v32 }
 0x168   : > { %v3047_v59 = vpack.i.bf16 %v2621_v57, %v2620_v56  ;;  %v3135_v16 = vpack.i.bf16 %v2622_v58, %v2619_v55  ;;  %v851_v60 = vpop.permute.xlu0 %850 }
 0x169   : > { %vm864_vm8 = vcmp.eq.s32.totalorder %v851_v60, %v3776_v25  ;;  %vm865_vm14 = vcmp.eq.s32.totalorder %v851_v60, %v3779_v26  ;;  %vm866_vm3 = vcmp.eq.s32.totalorder %v851_v60, %v3782_v27  ;;  %vm867_vm0 = vcmp.eq.s32.totalorder %v851_v60, %v3785_v28 }
 0x16a   : > { %3048 = vxpose.xlu1.b32.cont [3/4] (short) %v3047_v59, 128  ;;  %v2623_v61 = vsel %vm864_vm8, 1.0, %v3458_v32  ;;  %v2624_v62 = vsel %vm865_vm14, 1.0, %v3458_v32  ;;  %v2625_v63 = vsel %vm866_vm3, 1.0, %v3458_v32  ;;  %v2626_v1 = vsel %vm867_vm0, 1.0, %v3458_v32  ;;  %3136 = vxpose.xlu0.b32.cont [3/4] (short) %v3135_v16, 128 }
 0x16b   : > { %v3049_v2 = vpack.i.bf16 %v2625_v63, %v2624_v62  ;;  %v3137_v3 = vpack.i.bf16 %v2626_v1, %v2623_v61 }
 0x16e   : > { %3050 = vxpose.xlu1.b32.end [4/4] (short) %v3049_v2, 128  ;;  %3138 = vxpose.xlu0.b32.end [4/4] (short) %v3137_v3, 128 }
 0x1e2   : > { %v3819_v4 = vpop.trf.xlu1  ;;  %v3821_v5 = vpop.trf.xlu0 }
 0x1e3   : > { %v3140_v6 = vunpack.i.l.bf16 %v3821_v5  ;;  %v3055_v55 = vunpack.i.h.bf16 %v3819_v4  ;;  %v3052_v57 = vunpack.i.l.bf16 %v3819_v4 }
 0x1e5   : > { %2808 = vmatprep.mubr.msk.f32.mxu0 %vm1092_vm13, %v3140_v6 }
 0x1e6   : > { %v3825_v7 = vpop.trf.xlu1  ;;  %v3827_v8 = vpop.trf.xlu0 }
 0x1e7   : > { %v3145_v9 = vunpack.i.l.bf16 %v3827_v8  ;;  %v3060_v58 = vunpack.i.h.bf16 %v3825_v7  ;;  %v3057_v59 = vunpack.i.l.bf16 %v3825_v7 }
 0x1e9   : > { %2809 = vmatmul.mubr.msk.f32.vlgmr.msra.gmra.mrb[4].mxu0 %vm1092_vm13, %v3145_v9 }
 0x1ea   : > { %v3831_v10 = vpop.trf.xlu1  ;;  %v3833_v11 = vpop.trf.xlu0 }
 0x1eb   : > { %v3150_v12 = vunpack.i.l.bf16 %v3833_v11  ;;  %v3065_v16 = vunpack.i.h.bf16 %v3831_v10  ;;  %v3062_v60 = vunpack.i.l.bf16 %v3831_v10 }
 0x1ed   : > { %2811 = vmatprep.mubr.msk.f32.mxu0 %vm1092_vm13, %v3150_v12 }
 0x1ee   : > { %v3837_v13 = vpop.trf.xlu1  ;;  %v3839_v0 = vpop.trf.xlu0 }
 0x1ef   : > { %v3155_v14 = vunpack.i.l.bf16 %v3839_v0  ;;  %v3070_v61 = vunpack.i.h.bf16 %v3837_v13  ;;  %v3067_v62 = vunpack.i.l.bf16 %v3837_v13 }
 0x1f1   : > { %2812 = vmatmul.mubr.msk.f32.gmra.mrb[6].mxu0 %vm1092_vm13, %v3155_v14 }
 0x1f2   : > { %v3843_v15 = vpop.trf.xlu1  ;;  %v3845_v18 = vpop.trf.xlu0 }
 0x1f3   : > { %v3160_v19 = vunpack.i.l.bf16 %v3845_v18  ;;  %v3075_v63 = vunpack.i.h.bf16 %v3843_v15  ;;  %v3072_v1 = vunpack.i.l.bf16 %v3843_v15 }
 0x1f5   : > { %2814 = vmatprep.mubr.msk.f32.mxu0 %vm1092_vm13, %v3160_v19 }
 0x1f6   : > { %v3849_v20 = vpop.trf.xlu1  ;;  %v3851_v21 = vpop.trf.xlu0 }
 0x1f7   : > { %v3165_v22 = vunpack.i.l.bf16 %v3851_v21  ;;  %v3080_v2 = vunpack.i.h.bf16 %v3849_v20  ;;  %v3077_v3 = vunpack.i.l.bf16 %v3849_v20 }
 0x1f9   : > { %2815 = vmatmul.mubr.msk.f32.gmra.mrb[8].mxu0 %vm1092_vm13, %v3165_v22 }
 0x1fa   : > { %v3855_v23 = vpop.trf.xlu1  ;;  %v3857_v24 = vpop.trf.xlu0 }
 0x1fb   : > { %v3170_v25 = vunpack.i.l.bf16 %v3857_v24  ;;  %v3085_v4 = vunpack.i.h.bf16 %v3855_v23  ;;  %v3082_v6 = vunpack.i.l.bf16 %v3855_v23 }
 0x1fd   : > { %2817 = vmatprep.mubr.msk.f32.mxu0 %vm1092_vm13, %v3170_v25 }
 0x1fe   : > { %v3861_v26 = vpop.trf.xlu1  ;;  %v3863_v27 = vpop.trf.xlu0 }
 0x1ff   : > { %v3175_v28 = vunpack.i.l.bf16 %v3863_v27  ;;  %v3090_v7 = vunpack.i.h.bf16 %v3861_v26  ;;  %v3087_v9 = vunpack.i.l.bf16 %v3861_v26 }
 0x201   : > { %2818 = vmatmul.mubr.msk.f32.gmra.mrb[10].mxu0 %vm1092_vm13, %v3175_v28 }
 0x202   : > { %v3867_v29 = vpop.trf.xlu1  ;;  %v3869_v30 = vpop.trf.xlu0 }
 0x203   : > { %v3180_v31 = vunpack.i.l.bf16 %v3869_v30  ;;  %v3095_v10 = vunpack.i.h.bf16 %v3867_v29  ;;  %v3092_v12 = vunpack.i.l.bf16 %v3867_v29  ;;  %v3143_v29 = vunpack.i.h.bf16 %v3821_v5 }
 0x204   : > { %v3168_v5 = vunpack.i.h.bf16 %v3851_v21 }
 0x205   : > { %2820 = vmatprep.mubr.msk.f32.mxu0 %vm1092_vm13, %v3180_v31  ;;  %v3148_v31 = vunpack.i.h.bf16 %v3827_v8  ;;  %v3173_v8 = vunpack.i.h.bf16 %v3857_v24 }
 0x206   : > { %v3873_v32 = vpop.trf.xlu1  ;;  %v3875_v17 = vpop.trf.xlu0 }
 0x207   : > { %v3185_v33 = vunpack.i.l.bf16 %v3875_v17  ;;  %v3100_v13 = vunpack.i.h.bf16 %v3873_v32  ;;  %v3097_v14 = vunpack.i.l.bf16 %v3873_v32  ;;  %v3459_v32 = vmov 32  }
 0x208   : > { %3219 = vset.pattern.permute.xlu1 %v3459_v32  ;;  %3220 = vset.pattern.permute.xlu0 %v3459_v32 }
 0x209   : > { %2821 = vmatmul.mubr.msk.f32.gmra.mrb[12].mxu0 %vm1092_vm13, %v3185_v33  ;;  %v3153_v33 = vunpack.i.h.bf16 %v3833_v11  ;;  %v3178_v11 = vunpack.i.h.bf16 %v3863_v27 }
 0x20a   : > { %v3879_v34 = vpop.trf.xlu1  ;;  %v3881_v35 = vpop.trf.xlu0 }
 0x20b   : > { %v3190_v36 = vunpack.i.l.bf16 %v3881_v35  ;;  %v3105_v15 = vunpack.i.h.bf16 %v3879_v34  ;;  %v3102_v19 = vunpack.i.l.bf16 %v3879_v34  ;;  %v3158_v34 = vunpack.i.h.bf16 %v3839_v0 }
 0x20c   : > { %v3188_v0 = vunpack.i.h.bf16 %v3875_v17 }
 0x20d   : > { %2823 = vmatprep.mubr.msk.f32.mxu0 %vm1092_vm13, %v3190_v36  ;;  %v3163_v36 = vunpack.i.h.bf16 %v3845_v18  ;;  %v3193_v18 = vunpack.i.h.bf16 %v3881_v35 }
 0x20e   : > { %v3885_v37 = vpop.trf.xlu1  ;;  %v3887_v38 = vpop.trf.xlu0 }
 0x20f   : > { %v3195_v39 = vunpack.i.l.bf16 %v3887_v38  ;;  %v3110_v20 = vunpack.i.h.bf16 %v3885_v37  ;;  %v3107_v22 = vunpack.i.l.bf16 %v3885_v37  ;;  %v3183_v37 = vunpack.i.h.bf16 %v3869_v30 }
 0x210   : > { %v3198_v21 = vunpack.i.h.bf16 %v3887_v38 }
 0x211   : > { %2824 = vmatmul.mubr.msk.f32.gmra.mrb[14].mxu0 %vm1092_vm13, %v3195_v39 }
 0x212   : > { %v3891_v40 = vpop.trf.xlu1  ;;  %v3893_v41 = vpop.trf.xlu0 }
 0x213   : > { %v3112_v42 = vunpack.i.l.bf16 %v3891_v40  ;;  %v3200_v43 = vunpack.i.l.bf16 %v3893_v41  ;;  %v3115_v23 = vunpack.i.h.bf16 %v3891_v40  ;;  %v3203_v24 = vunpack.i.h.bf16 %v3893_v41 }
 0x215   : > { %2850 = vmatprep.mubr.msk.f32.mxu1 %vm1092_vm13, %v3112_v42  ;;  %2826 = vmatprep.mubr.msk.f32.mxu0 %vm1092_vm13, %v3200_v43 }
 0x216   : > { %v3899_v44 = vpop.trf.xlu1  ;;  %v3902_v46 = vpop.trf.xlu0 }
 0x217   : > { %v3117_v45 = vunpack.i.l.bf16 %v3899_v44  ;;  %v3205_v47 = vunpack.i.l.bf16 %v3902_v46  ;;  %v3120_v25 = vunpack.i.h.bf16 %v3899_v44  ;;  %v3208_v27 = vunpack.i.h.bf16 %v3902_v46 }
 0x219   : > { %2851 = vmatmul.mubr.msk.f32.vlgmr.msra.gmra.mrb[0].mxu1 %vm1092_vm13, %v3117_v45  ;;  %2827 = vmatmul.mubr.msk.f32.gmra.mrb[16].mxu0 %vm1092_vm13, %v3205_v47 }
 0x21a   : > { %v3907_v48 = vpop.trf.xlu1  ;;  %v3910_v50 = vpop.trf.xlu0 }
 0x21b   : > { %v3122_v49 = vunpack.i.l.bf16 %v3907_v48  ;;  %v3210_v51 = vunpack.i.l.bf16 %v3910_v50  ;;  %v3125_v26 = vunpack.i.h.bf16 %v3907_v48  ;;  %v3213_v30 = vunpack.i.h.bf16 %v3910_v50 }
 0x21d   : > { %2853 = vmatprep.mubr.msk.f32.mxu1 %vm1092_vm13, %v3122_v49  ;;  %2829 = vmatprep.mubr.msk.f32.mxu0 %vm1092_vm13, %v3210_v51 }
 0x21e   : > { %v3915_v52 = vpop.trf.xlu1  ;;  %v3918_v54 = vpop.trf.xlu0 }
 0x21f   : > { %v3127_v53 = vunpack.i.l.bf16 %v3915_v52  ;;  %v3215_v56 = vunpack.i.l.bf16 %v3918_v54  ;;  %v3130_v28 = vunpack.i.h.bf16 %v3915_v52  ;;  %v3218_v17 = vunpack.i.h.bf16 %v3918_v54 }
 0x221   : > { %2854 = vmatmul.mubr.msk.f32.gmra.mrb[2].mxu1 %vm1092_vm13, %v3127_v53  ;;  %2830 = vmatmul.mubr.msk.f32.gmra.mrb[18].mxu0 %vm1092_vm13, %v3215_v56 }
 0x222   : > { %2856 = vmatprep.mubr.msk.f32.mxu1 %vm1092_vm13, %v3055_v55  ;;  %2832 = vmatprep.mubr.msk.f32.mxu0 %vm1092_vm13, %v3052_v57 }
 0x225   : > { %2857 = vmatmul.mubr.msk.f32.gmra.mrb[4].mxu1 %vm1092_vm13, %v3060_v58  ;;  %2833 = vmatmul.mubr.msk.f32.gmra.mrb[20].mxu0 %vm1092_vm13, %v3057_v59 }
 0x226   : > { %2859 = vmatprep.mubr.msk.f32.mxu1 %vm1092_vm13, %v3065_v16  ;;  %2835 = vmatprep.mubr.msk.f32.mxu0 %vm1092_vm13, %v3062_v60 }
 0x229   : > { %2860 = vmatmul.mubr.msk.f32.gmra.mrb[6].mxu1 %vm1092_vm13, %v3070_v61  ;;  %2836 = vmatmul.mubr.msk.f32.gmra.mrb[22].mxu0 %vm1092_vm13, %v3067_v62 }
 0x22a   : > { %2862 = vmatprep.mubr.msk.f32.mxu1 %vm1092_vm13, %v3075_v63  ;;  %2838 = vmatprep.mubr.msk.f32.mxu0 %vm1092_vm13, %v3072_v1 }
 0x22d   : > { %2863 = vmatmul.mubr.msk.f32.gmra.mrb[8].mxu1 %vm1092_vm13, %v3080_v2  ;;  %2839 = vmatmul.mubr.msk.f32.gmra.mrb[24].mxu0 %vm1092_vm13, %v3077_v3 }
 0x22e   : > { %2865 = vmatprep.mubr.msk.f32.mxu1 %vm1092_vm13, %v3085_v4  ;;  %2841 = vmatprep.mubr.msk.f32.mxu0 %vm1092_vm13, %v3082_v6 }
 0x231   : > { %2866 = vmatmul.mubr.msk.f32.gmra.mrb[10].mxu1 %vm1092_vm13, %v3090_v7  ;;  %2842 = vmatmul.mubr.msk.f32.gmra.mrb[26].mxu0 %vm1092_vm13, %v3087_v9 }
 0x232   : > { %2868 = vmatprep.mubr.msk.f32.mxu1 %vm1092_vm13, %v3095_v10  ;;  %2844 = vmatprep.mubr.msk.f32.mxu0 %vm1092_vm13, %v3092_v12 }
 0x235   : > { %2869 = vmatmul.mubr.msk.f32.gmra.mrb[12].mxu1 %vm1092_vm13, %v3100_v13  ;;  %2845 = vmatmul.mubr.msk.f32.gmra.mrb[28].mxu0 %vm1092_vm13, %v3097_v14 }
 0x236   : > { %2871 = vmatprep.mubr.msk.f32.mxu1 %vm1092_vm13, %v3105_v15  ;;  %2847 = vmatprep.mubr.msk.f32.mxu0 %vm1092_vm13, %v3102_v19 }
 0x239   : > { %2872 = vmatmul.mubr.msk.f32.gmra.mrb[14].mxu1 %vm1092_vm13, %v3110_v20  ;;  %2848 = vmatmul.mubr.msk.f32.gmra.mrb[30].mxu0 %vm1092_vm13, %v3107_v22 }
 0x23a   : > { %2874 = vmatprep.mubr.msk.f32.mxu1 %vm1092_vm13, %v3115_v23 }
 0x23d   : > { %2875 = vmatmul.mubr.msk.f32.gmra.mrb[16].mxu1 %vm1092_vm13, %v3120_v25 }
 0x23e   : > { %2877 = vmatprep.mubr.msk.f32.mxu1 %vm1092_vm13, %v3125_v26 }
 0x241   : > { %2878 = vmatmul.mubr.msk.f32.gmra.mrb[18].mxu1 %vm1092_vm13, %v3130_v28 }
 0x242   : > { %2880 = vmatprep.mubr.msk.f32.mxu1 %vm1092_vm13, %v3143_v29 }
 0x245   : > { %2881 = vmatmul.mubr.msk.f32.gmra.mrb[20].mxu1 %vm1092_vm13, %v3148_v31 }
 0x246   : > { %2883 = vmatprep.mubr.msk.f32.mxu1 %vm1092_vm13, %v3153_v33 }
 0x249   : > { %2884 = vmatmul.mubr.msk.f32.gmra.mrb[22].mxu1 %vm1092_vm13, %v3158_v34 }
 0x24a   : > { %2886 = vmatprep.mubr.msk.f32.mxu1 %vm1092_vm13, %v3163_v36 }
 0x24d   : > { %2887 = vmatmul.mubr.msk.f32.gmra.mrb[24].mxu1 %vm1092_vm13, %v3168_v5 }
 0x24e   : > { %2889 = vmatprep.mubr.msk.f32.mxu1 %vm1092_vm13, %v3173_v8 }
 0x251   : > { %2890 = vmatmul.mubr.msk.f32.gmra.mrb[26].mxu1 %vm1092_vm13, %v3178_v11 }
 0x252   : > { %2892 = vmatprep.mubr.msk.f32.mxu1 %vm1092_vm13, %v3183_v37 }
 0x255   : > { %2893 = vmatmul.mubr.msk.f32.gmra.mrb[28].mxu1 %vm1092_vm13, %v3188_v0 }
 0x256   : > { %2895 = vmatprep.mubr.msk.f32.mxu1 %vm1092_vm13, %v3193_v18 }
 0x259   : > { %2896 = vmatmul.mubr.msk.f32.gmra.mrb[30].mxu1 %vm1092_vm13, %v3198_v21 }
 0x25a   : > { %2898 = vmatprep.mubr.msk.f32.mxu1 %vm1092_vm13, %v3203_v24 }
 0x25d   : > { %2899 = vmatmul.mubr.msk.f32.gmra.mrb[32].mxu1 %vm1092_vm13, %v3208_v27 }
 0x25e   : > { %2901 = vmatprep.mubr.msk.f32.mxu1 %vm1092_vm13, %v3213_v30 }
 0x261   : > { %2902 = vmatmul.mubr.msk.f32.gmra.mrb[34].mxu1 %vm1092_vm13, %v3218_v17 }
 0x2bc   : > { %v4011_v35 = vpop.f32.mrb[4].mxu0 }
 0x2bd   : > { %v4013_v38 = vpop.f32.mrb[5].mxu0  ;;  %v1866_v39 = vmax.f32 %v4011_v35, 1.0 }
 0x2be   : > { %v1865_v40 = vmax.f32 %v4013_v38, 1.0 }
 0x2bf   : > { %1936 = vperm.xlu1 %3219, %v1866_v39  }
 0x2c0   : > { %1931 = vperm.xlu0 %3220, %v1865_v40  }
 0x2c4   : > { %v4017_v41 = vpop.f32.mrb[6].mxu0 }
 0x2c5   : > { %v4019_v42 = vpop.f32.mrb[7].mxu0  ;;  %v1868_v43 = vmax.f32 %v4017_v41, 1.0 }
 0x2c6   : > { %v1867_v44 = vmax.f32 %v4019_v42, 1.0 }
 0x2c7   : > { %1946 = vperm.xlu0 %3220, %v1868_v43  }
 0x2c8   : > { %1941 = vperm.xlu1 %3219, %v1867_v44  }
 0x2cc   : > { %v4023_v45 = vpop.f32.mrb[8].mxu0 }
 0x2cd   : > { %v4025_v46 = vpop.f32.mrb[9].mxu0  ;;  %v1870_v47 = vmax.f32 %v4023_v45, 1.0 }
 0x2ce   : > { %v1869_v48 = vmax.f32 %v4025_v46, 1.0 }
 0x2cf   : > { %1956 = vperm.xlu0 %3220, %v1870_v47  }
 0x2d0   : > { %1951 = vperm.xlu1 %3219, %v1869_v48  }
 0x2d4   : > { %v4029_v49 = vpop.f32.mrb[10].mxu0 }
 0x2d5   : > { %v4031_v50 = vpop.f32.mrb[11].mxu0  ;;  %v1872_v51 = vmax.f32 %v4029_v49, 1.0 }
 0x2d6   : > { %v1871_v52 = vmax.f32 %v4031_v50, 1.0 }
 0x2d7   : > { %1966 = vperm.xlu0 %3220, %v1872_v51  }
 0x2d8   : > { %1961 = vperm.xlu1 %3219, %v1871_v52  }
 0x2dc   : > { %v4035_v53 = vpop.f32.mrb[12].mxu0 }
 0x2dd   : > { %v4037_v54 = vpop.f32.mrb[13].mxu0  ;;  %v1874_v55 = vmax.f32 %v4035_v53, 1.0 }
 0x2de   : > { %v1873_v56 = vmax.f32 %v4037_v54, 1.0 }
 0x2df   : > { %1976 = vperm.xlu0 %3220, %v1874_v55  }
 0x2e0   : > { %1971 = vperm.xlu1 %3219, %v1873_v56  }
 0x2e4   : > { %v4041_v57 = vpop.f32.mrb[14].mxu0 }
 0x2e5   : > { %v4043_v58 = vpop.f32.mrb[15].mxu0  ;;  %v1876_v59 = vmax.f32 %v4041_v57, 1.0 }
 0x2e6   : > { %v1875_v16 = vmax.f32 %v4043_v58, 1.0 }
 0x2e7   : > { %1986 = vperm.xlu0 %3220, %v1876_v59  }
 0x2e8   : > { %1981 = vperm.xlu1 %3219, %v1875_v16  }
 0x2ec   : > { %v4047_v60 = vpop.f32.mrb[0].mxu1  ;;  %v4049_v61 = vpop.f32.mrb[16].mxu0 }
 0x2ed   : > { %v4051_v62 = vpop.f32.mrb[1].mxu1  ;;  %v4053_v63 = vpop.f32.mrb[17].mxu0  ;;  %v1878_v1 = vmax.f32 %v4049_v61, 1.0  ;;  %v1894_v3 = vmax.f32 %v4047_v60, 1.0 }
 0x2ee   : > { %v1877_v2 = vmax.f32 %v4053_v63, 1.0  ;;  %v1893_v4 = vmax.f32 %v4051_v62, 1.0 }
 0x2ef   : > { %1996 = vperm.xlu0 %3220, %v1878_v1  }
 0x2f0   : > { %1991 = vperm.xlu1 %3219, %v1877_v2  }
 0x2f3   : > { %2076 = vperm.xlu0 %3220, %v1894_v3  }
 0x2f4   : > { %v4059_v6 = vpop.f32.mrb[2].mxu1  ;;  %v4061_v7 = vpop.f32.mrb[18].mxu0  ;;  %2071 = vperm.xlu1 %3219, %v1893_v4  }
 0x2f5   : > { %v4063_v9 = vpop.f32.mrb[3].mxu1  ;;  %v4065_v10 = vpop.f32.mrb[19].mxu0  ;;  %v1880_v13 = vmax.f32 %v4061_v7, 1.0  ;;  %v1896_v22 = vmax.f32 %v4059_v6, 1.0 }
 0x2f6   : > { %v1879_v19 = vmax.f32 %v4065_v10, 1.0  ;;  %v1895_v23 = vmax.f32 %v4063_v9, 1.0 }
 0x2f7   : > { %2006 = vperm.xlu0 %3220, %v1880_v13  }
 0x2f8   : > { %v4067_v12 = vpop.f32.mrb[4].mxu1  ;;  %v4070_v14 = vpop.f32.mrb[20].mxu0  ;;  %2001 = vperm.xlu1 %3219, %v1879_v19  }
 0x2f9   : > { %v4072_v15 = vpop.f32.mrb[5].mxu1  ;;  %v4075_v20 = vpop.f32.mrb[21].mxu0  ;;  %v1882_v32 = vmax.f32 %v4070_v14, 1.0  ;;  %v1898_v11 = vmax.f32 %v4067_v12, 1.0 }
 0x2fa   : > { %v1881_v36 = vmax.f32 %v4075_v20, 1.0  ;;  %v1897_v18 = vmax.f32 %v4072_v15, 1.0 }
 0x2fb   : > { %2086 = vperm.xlu0 %3220, %v1896_v22  }
 0x2fc   : > { %v4079_v25 = vpop.f32.mrb[6].mxu1  ;;  %v4081_v26 = vpop.f32.mrb[22].mxu0  ;;  %2081 = vperm.xlu1 %3219, %v1895_v23  }
 0x2fd   : > { %v4083_v28 = vpop.f32.mrb[7].mxu1  ;;  %v4085_v29 = vpop.f32.mrb[23].mxu0  ;;  %v1884_v27 = vmax.f32 %v4081_v26, 1.0  ;;  %v1900_v44 = vmax.f32 %v4079_v25, 1.0 }
 0x2fe   : > { %v1883_v39 = vmax.f32 %v4085_v29, 1.0  ;;  %v1899_v51 = vmax.f32 %v4083_v28, 1.0 }
 0x2ff   : > { %2016 = vperm.xlu0 %3220, %v1882_v32  }
 0x300   : > { %v4087_v31 = vpop.f32.mrb[8].mxu1  ;;  %v4090_v33 = vpop.f32.mrb[24].mxu0  ;;  %2011 = vperm.xlu1 %3219, %v1881_v36  }
 0x301   : > { %v4092_v34 = vpop.f32.mrb[9].mxu1  ;;  %v4095_v5 = vpop.f32.mrb[25].mxu0  ;;  %v1886_v56 = vmax.f32 %v4090_v33, 1.0  ;;  %v1902_v2 = vmax.f32 %v4087_v31, 1.0 }
 0x302   : > { %v1885_v16 = vmax.f32 %v4095_v5, 1.0  ;;  %v1901_v4 = vmax.f32 %v4092_v34, 1.0 }
 0x303   : > { %2096 = vperm.xlu0 %3220, %v1898_v11  }
 0x304   : > { %v4097_v8 = vpop.f32.mrb[10].mxu1  ;;  %v4100_v37 = vpop.f32.mrb[26].mxu0  ;;  %2091 = vperm.xlu1 %3219, %v1897_v18  }
 0x305   : > { %v4102_v0 = vpop.f32.mrb[11].mxu1  ;;  %v4105_v21 = vpop.f32.mrb[27].mxu0  ;;  %v1888_v19 = vmax.f32 %v4100_v37, 1.0  ;;  %v1904_v36 = vmax.f32 %v4097_v8, 1.0 }
 0x306   : > { %v1887_v23 = vmax.f32 %v4105_v21, 1.0  ;;  %v1903_v18 = vmax.f32 %v4102_v0, 1.0 }
 0x307   : > { %2026 = vperm.xlu0 %3220, %v1884_v27  }
 0x308   : > { %v4107_v24 = vpop.f32.mrb[12].mxu1  ;;  %v4110_v30 = vpop.f32.mrb[28].mxu0  ;;  %2021 = vperm.xlu1 %3219, %v1883_v39  }
 0x309   : > { %4427 = vst [vmem:[#allocation9_spill] sm:$0xff] %v4107_v24  ;;  %v4112_v17 = vpop.f32.mrb[13].mxu1  ;;  %v4115_v40 = vpop.f32.mrb[29].mxu0  ;;  %v1890_v39 = vmax.f32 %v4110_v30, 1.0 }
 0x30a   : > { %4428 = vst [vmem:[#allocation10_spill] sm:$0xff] %v4112_v17 }
 0x30b   : > { %2106 = vperm.xlu0 %3220, %v1900_v44  }
 0x30c   : > { %v4117_v43 = vpop.f32.mrb[14].mxu1  ;;  %v4120_v47 = vpop.f32.mrb[30].mxu0  ;;  %2101 = vperm.xlu1 %3219, %v1899_v51   ;;  %v1889_v51 = vmax.f32 %v4115_v40, 1.0 }
 0x30d   : > { %4429 = vst [vmem:[#allocation11_spill] sm:$0xff] %v4117_v43  ;;  %4430 = vst [vmem:[#allocation12_spill] sm:$0xff] %v4120_v47  ;;  %v4122_v48 = vpop.f32.mrb[15].mxu1  ;;  %v4125_v52 = vpop.f32.mrb[31].mxu0 }
 0x30e   : > { %4431 = vst [vmem:[#allocation13_spill] sm:$0xff] %v4122_v48  ;;  %4432 = vst [vmem:[#allocation14_spill] sm:$0xff] %v4125_v52 }
 0x30f   : > { %2036 = vperm.xlu0 %3220, %v1886_v56  }
 0x310   : > { %v4127_v55 = vpop.f32.mrb[16].mxu1  ;;  %2031 = vperm.xlu1 %3219, %v1885_v16   ;;  %v1906_v16 = vmax.f32 %v4107_v24, 1.0 }
 0x311   : > { %v4130_v59 = vpop.f32.mrb[17].mxu1 }
 0x312   : > { %4433 = vst [vmem:[#allocation15_spill] sm:$0xff] %v4130_v59 }
 0x313   : > { %2116 = vperm.xlu0 %3220, %v1902_v2  }
 0x314   : > { %v4133_v1 = vpop.f32.mrb[18].mxu1  ;;  %2111 = vperm.xlu1 %3219, %v1901_v4   ;;  %v1905_v4 = vmax.f32 %v4112_v17, 1.0  ;;  %v1907_v17 = vmax.f32 %v4122_v48, 1.0 }
 0x315   : > { %4434 = vst [vmem:[#allocation16_spill] sm:$0xff] %v4133_v1  ;;  %v4136_v3 = vpop.f32.mrb[19].mxu1 }
 0x316   : > { %v1911_v48 = vmax.f32 %v4136_v3, 1.0 }
 0x317   : > { %2046 = vperm.xlu0 %3220, %v1888_v19  }
 0x318   : > { %v4139_v13 = vpop.f32.mrb[20].mxu1  ;;  %2041 = vperm.xlu1 %3219, %v1887_v23   ;;  %v1892_v23 = vmax.f32 %v4120_v47, 1.0 }
 0x319   : > { %v4142_v22 = vpop.f32.mrb[21].mxu1 }
 0x31b   : > { %2126 = vperm.xlu0 %3220, %v1904_v36  }
 0x31c   : > { %v4145_v32 = vpop.f32.mrb[22].mxu1  ;;  %2121 = vperm.xlu1 %3219, %v1903_v18   ;;  %v1891_v18 = vmax.f32 %v4125_v52, 1.0  ;;  %v1909_v52 = vmax.f32 %v4130_v59, 1.0 }
 0x31d   : > { %v4148_v11 = vpop.f32.mrb[23].mxu1 }
 0x31f   : > { %2056 = vperm.xlu0 %3220, %v1890_v39  }
 0x320   : > { %v4151_v27 = vpop.f32.mrb[24].mxu1  ;;  %2051 = vperm.xlu1 %3219, %v1889_v51   ;;  %v1908_v51 = vmax.f32 %v4117_v43, 1.0 }
 0x321   : > { %4435 = vst [vmem:[#allocation17_spill] sm:$0xff] %v4151_v27  ;;  %v4154_v44 = vpop.f32.mrb[25].mxu1 }
 0x323   : > { %2136 = vperm.xlu0 %3220, %v1906_v16  }
 0x324   : > { %v4157_v56 = vpop.f32.mrb[26].mxu1  ;;  %2131 = vperm.xlu1 %3219, %v1905_v4   ;;  %v1910_v4 = vmax.f32 %v4127_v55, 1.0 }
 0x325   : > { %v4160_v2 = vpop.f32.mrb[27].mxu1 }
 0x326   : > { %4436 = vst [vmem:[#allocation18_spill] sm:$0xff] %v4160_v2 }
 0x327   : > { %2066 = vperm.xlu0 %3220, %v1892_v23  }
 0x328   : > { %v4163_v19 = vpop.f32.mrb[28].mxu1  ;;  %2061 = vperm.xlu1 %3219, %v1891_v18   ;;  %v1912_v18 = vmax.f32 %v4133_v1, 1.0  ;;  %v1918_v1 = vmax.f32 %v4151_v27, 1.0 }
 0x329   : > { %v4166_v36 = vpop.f32.mrb[29].mxu1 }
 0x32a   : > { %v1921_v27 = vmax.f32 %v4166_v36, 1.0 }
 0x32b   : > { %2146 = vperm.xlu0 %3220, %v1908_v51   ;;  %v1913_v51 = vmax.f32 %v4142_v22, 1.0 }
 0x32c   : > { %v4169_v39 = vpop.f32.mrb[30].mxu1  ;;  %2141 = vperm.xlu1 %3219, %v1907_v17   ;;  %v1914_v17 = vmax.f32 %v4139_v13, 1.0 }
 0x32d   : > { %v4172_v24 = vpop.f32.mrb[31].mxu1 }
 0x32f   : > { %2156 = vperm.xlu0 %3220, %v1910_v4   ;;  %v1916_v4 = vmax.f32 %v4145_v32, 1.0 }
 0x330   : > { %v4175_v16 = vpop.f32.mrb[32].mxu1  ;;  %2151 = vperm.xlu1 %3219, %v1909_v52   ;;  %v1915_v52 = vmax.f32 %v4148_v11, 1.0 }
 0x331   : > { %v4178_v47 = vpop.f32.mrb[33].mxu1 }
 0x333   : > { %2166 = vperm.xlu0 %3220, %v1912_v18   ;;  %v1917_v18 = vmax.f32 %v4154_v44, 1.0 }
 0x334   : > { %v4181_v23 = vpop.f32.mrb[34].mxu1  ;;  %2161 = vperm.xlu1 %3219, %v1911_v48  }
 0x335   : > { %v4184_v43 = vpop.f32.mrb[35].mxu1 }
 0x337   : > { %2176 = vperm.xlu0 %3220, %v1914_v17   ;;  %v1920_v17 = vmax.f32 %v4157_v56, 1.0 }
 0x338   : > { %2171 = vperm.xlu1 %3219, %v1913_v51   ;;  %v1919_v51 = vmax.f32 %v4160_v2, 1.0 }
 0x33b   : > { %2186 = vperm.xlu0 %3220, %v1916_v4   ;;  %v1922_v4 = vmax.f32 %v4163_v19, 1.0 }
 0x33c   : > { %2181 = vperm.xlu1 %3219, %v1915_v52  }
 0x33e   : > { %v1937_v59 = vpop.permute.xlu1 %1936 }
 0x33f   : > { %3227 = vrcp.f32 %v1937_v59  ;;  %2196 = vperm.xlu0 %3220, %v1918_v1   ;;  %v1932_v48 = vpop.permute.xlu0 %1931 }
 0x340   : > { %3229 = vrcp.f32 %v1932_v48  ;;  %2191 = vperm.xlu1 %3219, %v1917_v18   ;;  %v1924_v18 = vmax.f32 %v4169_v39, 1.0 }
 0x343   : > { %2206 = vperm.xlu0 %3220, %v1920_v17   ;;  %v1923_v17 = vmax.f32 %v4172_v24, 1.0 }
 0x344   : > { %2201 = vperm.xlu1 %3219, %v1919_v51  }
 0x346   : > { %v1947_v52 = vpop.permute.xlu0 %1946 }
 0x347   : > { %3231 = vrcp.f32 %v1947_v52  ;;  %v1942_v59 = vpop.permute.xlu1 %1941  ;;  %2216 = vperm.xlu0 %3220, %v1922_v4   ;;  %v1925_v52 = vmax.f32 %v4178_v47, 1.0 }
 0x348   : > { %3233 = vrcp.f32 %v1942_v59  ;;  %2211 = vperm.xlu1 %3219, %v1921_v27   ;;  %v1926_v27 = vmax.f32 %v4175_v16, 1.0  ;;  %v1928_v59 = vmax.f32 %v4181_v23, 1.0 }
 0x349   : > { %v3228_v1 = vpop.eup %3227 }
 0x34a   : > { %v3230_v48 = vpop.eup %3229  ;;  %v2252_v2 = vmul.f32 %v3228_v1, %v4011_v35 }
 0x34b   : > { %v2250_v51 = vmul.f32 %v3230_v48, %v4013_v38  ;;  %2226 = vperm.xlu0 %3220, %v1924_v18   ;;  %v1927_v18 = vmax.f32 %v4184_v43, 1.0 }
 0x34c   : > { %2378 = vst [vmem:[%s4204_s21 + $0x8] sm:$0xff] %v2252_v2  ;;  %2221 = vperm.xlu1 %3219, %v1923_v17  }
 0x34d   : > { %2377 = vst [vmem:[%s4204_s21] sm:$0xff] %v2250_v51 }
 0x34e   : > { %v1957_v4 = vpop.permute.xlu0 %1956 }
 0x34f   : > { %3235 = vrcp.f32 %v1957_v4  ;;  %v1952_v35 = vpop.permute.xlu1 %1951  ;;  %2236 = vperm.xlu0 %3220, %v1926_v27  }
 0x350   : > { %3237 = vrcp.f32 %v1952_v35  ;;  %2231 = vperm.xlu1 %3219, %v1925_v52  }
 0x351   : > { %v3232_v38 = vpop.eup %3231 }
 0x352   : > { %v3234_v1 = vpop.eup %3233  ;;  %v2256_v2 = vmul.f32 %v3232_v38, %v4017_v41 }
 0x353   : > { %v2254_v48 = vmul.f32 %v3234_v1, %v4019_v42  ;;  %2246 = vperm.xlu0 %3220, %v1928_v59  }
 0x354   : > { %2380 = vst [vmem:[%s4204_s21 + $0x18] sm:$0xff] %v2256_v2  ;;  %2241 = vperm.xlu1 %3219, %v1927_v18  }
 0x355   : > { %2379 = vst [vmem:[%s4204_s21 + $0x10] sm:$0xff] %v2254_v48 }
 0x356   : > { %v1967_v17 = vpop.permute.xlu0 %1966 }
 0x357   : > { %3239 = vrcp.f32 %v1967_v17  ;;  %v1962_v51 = vpop.permute.xlu1 %1961 }
 0x358   : > { %3241 = vrcp.f32 %v1962_v51 }
 0x359   : > { %v3236_v27 = vpop.eup %3235 }
 0x35a   : > { %v3238_v4 = vpop.eup %3237  ;;  %v2260_v52 = vmul.f32 %v3236_v27, %v4023_v45 }
 0x35b   : > { %v2258_v41 = vmul.f32 %v3238_v4, %v4025_v46 }
 0x35c   : > { %2382 = vst [vmem:[%s4204_s21 + $0x28] sm:$0xff] %v2260_v52 }
 0x35d   : > { %2381 = vst [vmem:[%s4204_s21 + $0x20] sm:$0xff] %v2258_v41 }
 0x35e   : > { %v1977_v35 = vpop.permute.xlu0 %1976 }
 0x35f   : > { %3243 = vrcp.f32 %v1977_v35  ;;  %v1972_v42 = vpop.permute.xlu1 %1971 }
 0x360   : > { %3245 = vrcp.f32 %v1972_v42 }
 0x361   : > { %v3240_v38 = vpop.eup %3239 }
 0x362   : > { %v3242_v59 = vpop.eup %3241  ;;  %v2264_v1 = vmul.f32 %v3240_v38, %v4029_v49 }
 0x363   : > { %v2262_v2 = vmul.f32 %v3242_v59, %v4031_v50 }
 0x364   : > { %2384 = vst [vmem:[%s4204_s21 + $0x38] sm:$0xff] %v2264_v1 }
 0x365   : > { %2383 = vst [vmem:[%s4204_s21 + $0x30] sm:$0xff] %v2262_v2 }
 0x366   : > { %v1987_v18 = vpop.permute.xlu0 %1986 }
 0x367   : > { %3247 = vrcp.f32 %v1987_v18  ;;  %v1982_v45 = vpop.permute.xlu1 %1981 }
 0x368   : > { %3249 = vrcp.f32 %v1982_v45 }
 0x369   : > { %v3244_v46 = vpop.eup %3243 }
 0x36a   : > { %v3246_v48 = vpop.eup %3245  ;;  %v2268_v17 = vmul.f32 %v3244_v46, %v4035_v53 }
 0x36b   : > { %v2266_v51 = vmul.f32 %v3246_v48, %v4037_v54 }
 0x36c   : > { %2386 = vst [vmem:[%s4204_s21 + $0x48] sm:$0xff] %v2268_v17 }
 0x36d   : > { %2385 = vst [vmem:[%s4204_s21 + $0x40] sm:$0xff] %v2266_v51 }
 0x36e   : > { %v1997_v27 = vpop.permute.xlu0 %1996 }
 0x36f   : > { %3251 = vrcp.f32 %v1997_v27  ;;  %v1992_v49 = vpop.permute.xlu1 %1991 }
 0x370   : > { %3253 = vrcp.f32 %v1992_v49 }
 0x371   : > { %v3248_v50 = vpop.eup %3247 }
 0x372   : > { %v3250_v4 = vpop.eup %3249  ;;  %v2272_v52 = vmul.f32 %v3248_v50, %v4041_v57  ;;  %v2077_v41 = vpop.permute.xlu0 %2076 }
 0x373   : > { %v2270_v35 = vmul.f32 %v3250_v4, %v4043_v58  ;;  %3255 = vrcp.f32 %v2077_v41  ;;  %v2072_v42 = vpop.permute.xlu1 %2071 }
 0x374   : > { %2388 = vst [vmem:[%s4204_s21 + $0x58] sm:$0xff] %v2272_v52  ;;  %3257 = vrcp.f32 %v2072_v42 }
 0x375   : > { %2387 = vst [vmem:[%s4204_s21 + $0x50] sm:$0xff] %v2270_v35 }
 0x376   : > { %v2007_v53 = vpop.permute.xlu0 %2006 }
 0x377   : > { %3259 = vrcp.f32 %v2007_v53  ;;  %v2002_v54 = vpop.permute.xlu1 %2001 }
 0x378   : > { %3261 = vrcp.f32 %v2002_v54 }
 0x379   : > { %v3252_v38 = vpop.eup %3251 }
 0x37a   : > { %v3254_v59 = vpop.eup %3253  ;;  %v2276_v1 = vmul.f32 %v3252_v38, %v4049_v61  ;;  %v2087_v57 = vpop.permute.xlu0 %2086 }
 0x37b   : > { %v2274_v2 = vmul.f32 %v3254_v59, %v4053_v63  ;;  %3263 = vrcp.f32 %v2087_v57  ;;  %v2082_v58 = vpop.permute.xlu1 %2081 }
 0x37c   : > { %2390 = vst [vmem:[%s4204_s21 + $0x68] sm:$0xff] %v2276_v1  ;;  %3265 = vrcp.f32 %v2082_v58 }
 0x37d   : > { %v3256_v18 = vpop.eup %3255  ;;  %2389 = vst [vmem:[%s4204_s21 + $0x60] sm:$0xff] %v2274_v2 }
 0x37e   : > { %v3258_v45 = vpop.eup %3257  ;;  %v2308_v46 = vmul.f32 %v3256_v18, %v4047_v60  ;;  %v2017_v48 = vpop.permute.xlu0 %2016 }
 0x37f   : > { %v2306_v17 = vmul.f32 %v3258_v45, %v4051_v62  ;;  %3267 = vrcp.f32 %v2017_v48  ;;  %v2012_v61 = vpop.permute.xlu1 %2011 }
 0x380   : > { %2406 = vst [vmem:[%s4204_s21 + $0xe8] sm:$0xff] %v2308_v46  ;;  %3269 = vrcp.f32 %v2012_v61 }
 0x381   : > { %v3260_v63 = vpop.eup %3259  ;;  %2405 = vst [vmem:[%s4204_s21 + $0xe0] sm:$0xff] %v2306_v17 }
 0x382   : > { %v3262_v51 = vpop.eup %3261  ;;  %v2280_v27 = vmul.f32 %v3260_v63, %v4061_v7  ;;  %v2097_v49 = vpop.permute.xlu0 %2096 }
 0x383   : > { %v2278_v50 = vmul.f32 %v3262_v51, %v4065_v10  ;;  %3271 = vrcp.f32 %v2097_v49  ;;  %v2092_v60 = vpop.permute.xlu1 %2091 }
 0x384   : > { %2392 = vst [vmem:[%s4204_s21 + $0x78] sm:$0xff] %v2280_v27  ;;  %3273 = vrcp.f32 %v2092_v60 }
 0x385   : > { %v3264_v62 = vpop.eup %3263  ;;  %2391 = vst [vmem:[%s4204_s21 + $0x70] sm:$0xff] %v2278_v50 }
 0x386   : > { %v3266_v4 = vpop.eup %3265  ;;  %v2312_v52 = vmul.f32 %v3264_v62, %v4059_v6  ;;  %v2027_v41 = vpop.permute.xlu0 %2026 }
 0x387   : > { %v2310_v35 = vmul.f32 %v3266_v4, %v4063_v9  ;;  %3275 = vrcp.f32 %v2027_v41  ;;  %v2022_v7 = vpop.permute.xlu1 %2021 }
 0x388   : > { %2408 = vst [vmem:[%s4204_s21 + $0xf8] sm:$0xff] %v2312_v52  ;;  %3277 = vrcp.f32 %v2022_v7 }
 0x389   : > { %v3268_v10 = vpop.eup %3267  ;;  %2407 = vst [vmem:[%s4204_s21 + $0xf0] sm:$0xff] %v2310_v35 }
 0x38a   : > { %v3270_v42 = vpop.eup %3269  ;;  %v2284_v53 = vmul.f32 %v3268_v10, %v4070_v14  ;;  %v2107_v54 = vpop.permute.xlu0 %2106 }
 0x38b   : > { %v2282_v38 = vmul.f32 %v3270_v42, %v4075_v20  ;;  %3279 = vrcp.f32 %v2107_v54  ;;  %v2102_v6 = vpop.permute.xlu1 %2101 }
 0x38c   : > { %2394 = vst [vmem:[%s4204_s21 + $0x88] sm:$0xff] %v2284_v53  ;;  %3281 = vrcp.f32 %v2102_v6 }
 0x38d   : > { %v3272_v9 = vpop.eup %3271  ;;  %2393 = vst [vmem:[%s4204_s21 + $0x80] sm:$0xff] %v2282_v38 }
 0x38e   : > { %v3274_v59 = vpop.eup %3273  ;;  %v2316_v1 = vmul.f32 %v3272_v9, %v4067_v12  ;;  %v2037_v57 = vpop.permute.xlu0 %2036 }
 0x38f   : > { %v2314_v2 = vmul.f32 %v3274_v59, %v4072_v15  ;;  %3283 = vrcp.f32 %v2037_v57  ;;  %v2032_v14 = vpop.permute.xlu1 %2031 }
 0x390   : > { %2410 = vst [vmem:[%s4204_s21 + $0x108] sm:$0xff] %v2316_v1  ;;  %3285 = vrcp.f32 %v2032_v14 }
 0x391   : > { %v3276_v20 = vpop.eup %3275  ;;  %2409 = vst [vmem:[%s4204_s21 + $0x100] sm:$0xff] %v2314_v2  ;;  %v4437_v2 = vld [vmem:[#allocation9_spill] sm:$0xff] }
 0x392   : > { %v3278_v58 = vpop.eup %3277  ;;  %v2288_v18 = vmul.f32 %v3276_v20, %v4081_v26  ;;  %v2117_v45 = vpop.permute.xlu0 %2116 }
 0x393   : > { %v2286_v46 = vmul.f32 %v3278_v58, %v4085_v29  ;;  %3287 = vrcp.f32 %v2117_v45  ;;  %v2112_v12 = vpop.permute.xlu1 %2111  ;;  %v4438_v58 = vld [vmem:[#allocation10_spill] sm:$0xff] }
 0x394   : > { %2396 = vst [vmem:[%s4204_s21 + $0x98] sm:$0xff] %v2288_v18  ;;  %3289 = vrcp.f32 %v2112_v12 }
 0x395   : > { %v3280_v15 = vpop.eup %3279  ;;  %2395 = vst [vmem:[%s4204_s21 + $0x90] sm:$0xff] %v2286_v46  ;;  %v4439_v46 = vld [vmem:[#allocation12_spill] sm:$0xff] }
 0x396   : > { %v3282_v48 = vpop.eup %3281  ;;  %v2320_v17 = vmul.f32 %v3280_v15, %v4079_v25  ;;  %v2047_v61 = vpop.permute.xlu0 %2046 }
 0x397   : > { %v2318_v63 = vmul.f32 %v3282_v48, %v4083_v28  ;;  %3291 = vrcp.f32 %v2047_v61  ;;  %v2042_v26 = vpop.permute.xlu1 %2041  ;;  %v4440_v48 = vld [vmem:[#allocation14_spill] sm:$0xff] }
 0x398   : > { %2412 = vst [vmem:[%s4204_s21 + $0x118] sm:$0xff] %v2320_v17  ;;  %3293 = vrcp.f32 %v2042_v26 }
 0x399   : > { %v3284_v29 = vpop.eup %3283  ;;  %2411 = vst [vmem:[%s4204_s21 + $0x110] sm:$0xff] %v2318_v63 }
 0x39a   : > { %v3286_v51 = vpop.eup %3285  ;;  %v2292_v27 = vmul.f32 %v3284_v29, %v4090_v33  ;;  %v2127_v49 = vpop.permute.xlu0 %2126  ;;  %v4441_v29 = vld [vmem:[#allocation11_spill] sm:$0xff] }
 0x39b   : > { %v2290_v50 = vmul.f32 %v3286_v51, %v4095_v5  ;;  %3295 = vrcp.f32 %v2127_v49  ;;  %v2122_v25 = vpop.permute.xlu1 %2121  ;;  %v4442_v49 = vld [vmem:[#allocation13_spill] sm:$0xff] }
 0x39c   : > { %2398 = vst [vmem:[%s4204_s21 + $0xa8] sm:$0xff] %v2292_v27  ;;  %3297 = vrcp.f32 %v2122_v25 }
 0x39d   : > { %v3288_v28 = vpop.eup %3287  ;;  %2397 = vst [vmem:[%s4204_s21 + $0xa0] sm:$0xff] %v2290_v50 }
 0x39e   : > { %v3290_v60 = vpop.eup %3289  ;;  %v2324_v62 = vmul.f32 %v3288_v28, %v4087_v31  ;;  %v2057_v4 = vpop.permute.xlu0 %2056 }
 0x39f   : > { %v2322_v52 = vmul.f32 %v3290_v60, %v4092_v34  ;;  %3299 = vrcp.f32 %v2057_v4  ;;  %v2052_v33 = vpop.permute.xlu1 %2051 }
 0x3a0   : > { %2414 = vst [vmem:[%s4204_s21 + $0x128] sm:$0xff] %v2324_v62  ;;  %3301 = vrcp.f32 %v2052_v33 }
 0x3a1   : > { %v3292_v5 = vpop.eup %3291  ;;  %2413 = vst [vmem:[%s4204_s21 + $0x120] sm:$0xff] %v2322_v52  ;;  %v4443_v52 = vld [vmem:[#allocation15_spill] sm:$0xff] }
 0x3a2   : > { %v3294_v41 = vpop.eup %3293  ;;  %v2296_v35 = vmul.f32 %v3292_v5, %v4100_v37  ;;  %v2137_v7 = vpop.permute.xlu0 %2136 }
 0x3a3   : > { %v2294_v10 = vmul.f32 %v3294_v41, %v4105_v21  ;;  %3303 = vrcp.f32 %v2137_v7  ;;  %v2132_v31 = vpop.permute.xlu1 %2131  ;;  %v4444_v7 = vld [vmem:[#allocation16_spill] sm:$0xff] }
 0x3a4   : > { %2400 = vst [vmem:[%s4204_s21 + $0xb8] sm:$0xff] %v2296_v35  ;;  %3305 = vrcp.f32 %v2132_v31 }
 0x3a5   : > { %v3296_v34 = vpop.eup %3295  ;;  %2399 = vst [vmem:[%s4204_s21 + $0xb0] sm:$0xff] %v2294_v10 }
 0x3a6   : > { %v3298_v42 = vpop.eup %3297  ;;  %v2328_v53 = vmul.f32 %v3296_v34, %v4097_v8  ;;  %v2067_v54 = vpop.permute.xlu0 %2066 }
 0x3a7   : > { %v2326_v38 = vmul.f32 %v3298_v42, %v4102_v0  ;;  %3307 = vrcp.f32 %v2067_v54  ;;  %v2062_v37 = vpop.permute.xlu1 %2061 }
 0x3a8   : > { %2416 = vst [vmem:[%s4204_s21 + $0x138] sm:$0xff] %v2328_v53  ;;  %3309 = vrcp.f32 %v2062_v37 }
 0x3a9   : > { %v3300_v21 = vpop.eup %3299  ;;  %2415 = vst [vmem:[%s4204_s21 + $0x130] sm:$0xff] %v2326_v38 }
 0x3aa   : > { %v3302_v6 = vpop.eup %3301  ;;  %v2300_v9 = vmul.f32 %v3300_v21, %v4110_v30  ;;  %v2147_v59 = vpop.permute.xlu0 %2146 }
 0x3ab   : > { %v2298_v1 = vmul.f32 %v3302_v6, %v4115_v40  ;;  %3311 = vrcp.f32 %v2147_v59  ;;  %v2142_v8 = vpop.permute.xlu1 %2141 }
 0x3ac   : > { %2402 = vst [vmem:[%s4204_s21 + $0xc8] sm:$0xff] %v2300_v9  ;;  %3313 = vrcp.f32 %v2142_v8 }
 0x3ad   : > { %v3304_v0 = vpop.eup %3303  ;;  %2401 = vst [vmem:[%s4204_s21 + $0xc0] sm:$0xff] %v2298_v1 }
 0x3ae   : > { %v3306_v57 = vpop.eup %3305  ;;  %v2332_v14 = vmul.f32 %v3304_v0, %v4437_v2  ;;  %v2157_v20 = vpop.permute.xlu0 %2156  ;;  %v4445_v0 = vld [vmem:[#allocation17_spill] sm:$0xff] }
 0x3af   : > { %v2330_v18 = vmul.f32 %v3306_v57, %v4438_v58  ;;  %3315 = vrcp.f32 %v2157_v20  ;;  %v2152_v30 = vpop.permute.xlu1 %2151 }
 0x3b0   : > { %2418 = vst [vmem:[%s4204_s21 + $0x148] sm:$0xff] %v2332_v14  ;;  %3317 = vrcp.f32 %v2152_v30  ;;  %v4446_v30 = vld [vmem:[#allocation18_spill] sm:$0xff] }
 0x3b1   : > { %v3308_v40 = vpop.eup %3307  ;;  %2417 = vst [vmem:[%s4204_s21 + $0x140] sm:$0xff] %v2330_v18 }
 0x3b2   : > { %v3310_v45 = vpop.eup %3309  ;;  %v2304_v12 = vmul.f32 %v3308_v40, %v4439_v46  ;;  %v2167_v15 = vpop.permute.xlu0 %2166 }
 0x3b3   : > { %v2302_v17 = vmul.f32 %v3310_v45, %v4440_v48  ;;  %3319 = vrcp.f32 %v2167_v15  ;;  %v2162_v61 = vpop.permute.xlu1 %2161 }
 0x3b4   : > { %2404 = vst [vmem:[%s4204_s21 + $0xd8] sm:$0xff] %v2304_v12  ;;  %3321 = vrcp.f32 %v2162_v61 }
 0x3b5   : > { %v3312_v63 = vpop.eup %3311  ;;  %2403 = vst [vmem:[%s4204_s21 + $0xd0] sm:$0xff] %v2302_v17 }
 0x3b6   : > { %v3314_v26 = vpop.eup %3313  ;;  %v2336_v51 = vmul.f32 %v3312_v63, %v4441_v29  ;;  %v2177_v27 = vpop.permute.xlu0 %2176 }
 0x3b7   : > { %v2334_v50 = vmul.f32 %v3314_v26, %v4442_v49  ;;  %3323 = vrcp.f32 %v2177_v27  ;;  %v2172_v25 = vpop.permute.xlu1 %2171 }
 0x3b8   : > { %2420 = vst [vmem:[%s4204_s21 + $0x158] sm:$0xff] %v2336_v51  ;;  %3325 = vrcp.f32 %v2172_v25 }
 0x3b9   : > { %v3316_v28 = vpop.eup %3315  ;;  %2419 = vst [vmem:[%s4204_s21 + $0x150] sm:$0xff] %v2334_v50 }
 0x3ba   : > { %v3318_v60 = vpop.eup %3317  ;;  %v2340_v62 = vmul.f32 %v3316_v28, %v4127_v55  ;;  %v2187_v4 = vpop.permute.xlu0 %2186 }
 0x3bb   : > { %v2338_v33 = vmul.f32 %v3318_v60, %v4443_v52  ;;  %3327 = vrcp.f32 %v2187_v4  ;;  %v2182_v5 = vpop.permute.xlu1 %2181 }
 0x3bc   : > { %2422 = vst [vmem:[%s4204_s21 + $0x168] sm:$0xff] %v2340_v62  ;;  %3329 = vrcp.f32 %v2182_v5 }
 0x3bd   : > { %v3320_v41 = vpop.eup %3319  ;;  %2421 = vst [vmem:[%s4204_s21 + $0x160] sm:$0xff] %v2338_v33 }
 0x3be   : > { %v3322_v35 = vpop.eup %3321  ;;  %v2344_v10 = vmul.f32 %v3320_v41, %v4444_v7  ;;  %v2197_v31 = vpop.permute.xlu0 %2196 }
 0x3bf   : > { %v2342_v34 = vmul.f32 %v3322_v35, %v4136_v3  ;;  %3331 = vrcp.f32 %v2197_v31  ;;  %v2192_v55 = vpop.permute.xlu1 %2191 }
 0x3c0   : > { %2424 = vst [vmem:[%s4204_s21 + $0x178] sm:$0xff] %v2344_v10  ;;  %3333 = vrcp.f32 %v2192_v55 }
 0x3c1   : > { %v3324_v42 = vpop.eup %3323  ;;  %2423 = vst [vmem:[%s4204_s21 + $0x170] sm:$0xff] %v2342_v34 }
 0x3c2   : > { %v3326_v53 = vpop.eup %3325  ;;  %v2348_v54 = vmul.f32 %v3324_v42, %v4139_v13  ;;  %v2207_v38 = vpop.permute.xlu0 %2206 }
 0x3c3   : > { %v2346_v37 = vmul.f32 %v3326_v53, %v4142_v22  ;;  %3335 = vrcp.f32 %v2207_v38  ;;  %v2202_v21 = vpop.permute.xlu1 %2201 }
 0x3c4   : > { %2426 = vst [vmem:[%s4204_s21 + $0x188] sm:$0xff] %v2348_v54  ;;  %3337 = vrcp.f32 %v2202_v21 }
 0x3c5   : > { %v3328_v3 = vpop.eup %3327  ;;  %2425 = vst [vmem:[%s4204_s21 + $0x180] sm:$0xff] %v2346_v37 }
 0x3c6   : > { %v3330_v6 = vpop.eup %3329  ;;  %v2352_v9 = vmul.f32 %v3328_v3, %v4145_v32  ;;  %v2217_v59 = vpop.permute.xlu0 %2216 }
 0x3c7   : > { %v2350_v1 = vmul.f32 %v3330_v6, %v4148_v11  ;;  %3339 = vrcp.f32 %v2217_v59  ;;  %v2212_v13 = vpop.permute.xlu1 %2211 }
 0x3c8   : > { %2428 = vst [vmem:[%s4204_s21 + $0x198] sm:$0xff] %v2352_v9  ;;  %3341 = vrcp.f32 %v2212_v13 }
 0x3c9   : > { %v3332_v22 = vpop.eup %3331  ;;  %2427 = vst [vmem:[%s4204_s21 + $0x190] sm:$0xff] %v2350_v1 }
 0x3ca   : > { %v3334_v8 = vpop.eup %3333  ;;  %v2356_v57 = vmul.f32 %v3332_v22, %v4445_v0  ;;  %v2227_v2 = vpop.permute.xlu0 %2226 }
 0x3cb   : > { %v2354_v14 = vmul.f32 %v3334_v8, %v4154_v44  ;;  %3343 = vrcp.f32 %v2227_v2  ;;  %v2222_v32 = vpop.permute.xlu1 %2221 }
 0x3cc   : > { %2430 = vst [vmem:[%s4204_s21 + $0x1a8] sm:$0xff] %v2356_v57  ;;  %3345 = vrcp.f32 %v2222_v32 }
 0x3cd   : > { %v3336_v11 = vpop.eup %3335  ;;  %2429 = vst [vmem:[%s4204_s21 + $0x1a0] sm:$0xff] %v2354_v14 }
 0x3ce   : > { %v3338_v20 = vpop.eup %3337  ;;  %v2360_v58 = vmul.f32 %v3336_v11, %v4157_v56  ;;  %v2237_v18 = vpop.permute.xlu0 %2236 }
 0x3cf   : > { %v2358_v40 = vmul.f32 %v3338_v20, %v4446_v30  ;;  %3347 = vrcp.f32 %v2237_v18  ;;  %v2232_v45 = vpop.permute.xlu1 %2231 }
 0x3d0   : > { %2432 = vst [vmem:[%s4204_s21 + $0x1b8] sm:$0xff] %v2360_v58  ;;  %3349 = vrcp.f32 %v2232_v45 }
 0x3d1   : > { %v3340_v44 = vpop.eup %3339  ;;  %2431 = vst [vmem:[%s4204_s21 + $0x1b0] sm:$0xff] %v2358_v40 }
 0x3d2   : > { %v3342_v46 = vpop.eup %3341  ;;  %v2364_v12 = vmul.f32 %v3340_v44, %v4163_v19  ;;  %v2247_v15 = vpop.permute.xlu0 %2246 }
 0x3d3   : > { %v2362_v48 = vmul.f32 %v3342_v46, %v4166_v36  ;;  %3351 = vrcp.f32 %v2247_v15  ;;  %v2242_v56 = vpop.permute.xlu1 %2241 }
 0x3d4   : > { %2434 = vst [vmem:[%s4204_s21 + $0x1c8] sm:$0xff] %v2364_v12  ;;  %3353 = vrcp.f32 %v2242_v56 }
 0x3d5   : > { %v3344_v17 = vpop.eup %3343  ;;  %2433 = vst [vmem:[%s4204_s21 + $0x1c0] sm:$0xff] %v2362_v48 }
 0x3d6   : > { %v3346_v61 = vpop.eup %3345  ;;  %v2368_v63 = vmul.f32 %v3344_v17, %v4169_v39 }
 0x3d7   : > { %v2366_v26 = vmul.f32 %v3346_v61, %v4172_v24 }
 0x3d8   : > { %2436 = vst [vmem:[%s4204_s21 + $0x1d8] sm:$0xff] %v2368_v63 }
 0x3d9   : > { %v3348_v19 = vpop.eup %3347  ;;  %2435 = vst [vmem:[%s4204_s21 + $0x1d0] sm:$0xff] %v2366_v26 }
 0x3da   : > { %v3350_v36 = vpop.eup %3349  ;;  %v2372_v29 = vmul.f32 %v3348_v19, %v4175_v16 }
 0x3db   : > { %v2370_v51 = vmul.f32 %v3350_v36, %v4178_v47 }
 0x3dc   : > { %2438 = vst [vmem:[%s4204_s21 + $0x1e8] sm:$0xff] %v2372_v29 }
 0x3dd   : > { %v3352_v27 = vpop.eup %3351  ;;  %2437 = vst [vmem:[%s4204_s21 + $0x1e0] sm:$0xff] %v2370_v51 }
 0x3de   : > { %v3354_v39 = vpop.eup %3353  ;;  %v2376_v24 = vmul.f32 %v3352_v27, %v4181_v23 }
 0x3df   : > { %v2374_v47 = vmul.f32 %v3354_v39, %v4184_v43 }
 0x3e0   : > { %2440 = vst [vmem:[%s4204_s21 + $0x1f8] sm:$0xff] %v2376_v24 }
 0x3e1   : > { %2439 = vst [vmem:[%s4204_s21 + $0x1f0] sm:$0xff] %v2374_v47 }
 0x3e2   : > { %3383 = shalt.err (!%p3380_p3)
}
 0x3e3   : > { %s3384_s11 = scalar_lea.hbm %s4338_s13, 8192  ;;  %s3388_s20 = scalar_lea.hbm %s4400_s7, 16384 }
 0x3e4   : > { %p3385_p5 = scmp.ne.s32.totalorder %s4338_s13, %s3384_s11  ;;  %p3389_p9 = scmp.lt.u32.totalorder %s4338_s13, %s4400_s7 }
 0x3e5   : > { %p3390_p12 = scmp.lt.u32.totalorder %s3388_s20, %s3384_s11  ;;  %p3392_p11 = scmp.lt.u32.totalorder %s3384_s11, %s4338_s13 }
 0x3e6   : > { %p3386_p6 = pnand %p3385_p5, %p3546_p4 }
 0x3e7   : > { %p3391_p10 = por %p3390_p12, %p3389_p9 }
 0x3e8   : > { %p3387_p7 = pneg %p3386_p6 }
 0x3e9   : > { %p3393_p13 = por %p3392_p11, %p3391_p10 }
 0x3eb   : > { %p3394_p0 = pnand %p3393_p13, %p3387_p7 }
 0x3ed   : > { %3397 = shalt.err (!%p3394_p0)
}
 0x3ee   : > { %s3461_s0 = smov 128   ;;  %s3462_s9 = smov 8  }
 0x3ef   : > { %2972 = dma.vmem_to_hbm [thread:$0]  (%p3546_p4), %s4340_s25, 8192, %s4338_s13, %s4347_s29, %s3461_s0, %s3461_s0, %s3462_s9  }
 0x3f0 PF: > { %p2984_p1 = scmp.ge.s32.totalorder %s3452_s8, 2  ;;  %s2470_s23 = sand.u32 1, %s3432_s26  }
 0x3f1   : > { %s2471_s24 = scalar_lea.sflag [#allocation4], %s2470_s23 }
 0x3f2   : > { %p2979_p2 = pnand %p2984_p1, %p3553_p8 }
 0x3f4   : > { %3427 = dma.done.wait (!%p2979_p2), %s2471_s24, 8192  }
 0x3f5   : > { %3429 = vsyncadd (!%p2979_p2), %s2471_s24, 4294959104  ;;  %s22_s8 = sadd.s32 1, %s3452_s8   ;;  %s4447_s26 = smov %s3436_s27 }
 0x3f6   : > { %p19_p3 = scmp.ge.s32.totalorder %s22_s8, 4   ;;  %s4448_s27 = smov %s3440_s28 }
 0x3f7   : > { %s4449_s28 = smov %s3559_s15  ;;  %s4450_s29 = smov %s3448_s30 }
 0x3f8   : > { %s4451_s30 = smov %s4453_s10  ;;  %21 = sbr.rel (!%p19_p3) target bundleno = 7 (0x7), region = 102 }
 0x3ff   :  { %2476 = vsyncpa [#allocation4], 1 }
 0x400   :  { %2478 = vsyncpa [#allocation4 + $0x1], 1 }
 0x401   :  { %2479 = vsyncpa [#allocation5], 1 }
 0x402   :  { %2481 = vsyncpa [#allocation5 + $0x1], 1 }

</bundles_post_ra>
